<compile_context>
chip_gen: v5e
topology: v5e:2x2
jax: 0.10.0
libtpu: 0.0.40
codegen_flags: <defaults>
</compile_context>

<pallas_src>
import jax
import jax.numpy as jnp
from jax.experimental import pallas as pl
from jax.experimental.pallas import tpu as pltpu


EPS = 1e-5


def bn_relu_kernel(x_ref, params_ref, o_ref):
    # x_ref:      (N, Cb, L) f32   where L = H*W, Cb = channel block
    # params_ref: (Cb, 2)    f32   column 0 = gamma, column 1 = beta
    # o_ref:      (N, Cb, L) f32
    n_elems = x_ref.shape[0] * x_ref.shape[2]
    inv_n = 1.0 / float(n_elems)

    x = x_ref[...]
    # Single fused sweep: sum and sum-of-squares (lane-axis reduce on the XLU,
    # batch-axis reduce is plain VPU adds of vregs).
    s1 = jnp.sum(x, axis=(0, 2), keepdims=True)            # (1, Cb, 1)
    s2 = jnp.sum(x * x, axis=(0, 2), keepdims=True)        # (1, Cb, 1)

    mean = s1 * inv_n
    var = jnp.maximum(s2 * inv_n - mean * mean, 0.0)        # biased variance
    inv_std = jax.lax.rsqrt(var + EPS)                      # EUP, ~free slot

    params = params_ref[...]                                # (Cb, 2)
    gamma = params[:, 0:1]                                  # (Cb, 1)
    beta = params[:, 1:2]                                   # (Cb, 1)
    scale = gamma * inv_std                                 # (1, Cb, 1)
    bias = beta - mean * scale                              # (1, Cb, 1)

    # Normalize + affine + ReLU folded into one FMA + max, re-reading x from
    # the VMEM ref (keeps vreg live ranges short).
    o_ref[...] = jnp.maximum(x_ref[...] * scale + bias, 0.0)


def _channel_blocks(C):
    """2 channel blocks (one per TensorCore) on multi-TC chips, else 1."""
    try:
        kind = jax.devices()[0].device_kind.lower()
    except Exception:
        kind = ""
    multi_tc = any(tag in kind for tag in ("v7", "v4", "v5p"))
    if multi_tc and C % 256 == 0:
        return 2
    return 1


def batchnorm_relu(x_nchw, gamma, beta):
    """x_nchw: (N, C, H, W) float32 -> (N, C, H, W) float32."""
    N, C, H, W = x_nchw.shape
    L = H * W

    x3d = x_nchw.reshape(N, C, L).astype(jnp.float32)       # free reshape
    params = jnp.stack(
        [gamma.astype(jnp.float32), beta.astype(jnp.float32)], axis=-1
    )                                                       # (C, 2), one DMA

    n_blocks = _channel_blocks(C)
    c_block = C // n_blocks
    grid = (n_blocks,)
    semantics = ("parallel",) if n_blocks > 1 else ("arbitrary",)

    out3d = pl.pallas_call(
        bn_relu_kernel,
        out_shape=jax.ShapeDtypeStruct((N, C, L), jnp.float32),
        grid=grid,
        in_specs=[
            pl.BlockSpec((N, c_block, L), lambda i: (0, i, 0)),
            pl.BlockSpec((c_block, 2), lambda i: (i, 0)),
        ],
        out_specs=pl.BlockSpec((N, c_block, L), lambda i: (0, i, 0)),
        compiler_params=pltpu.CompilerParams(
            dimension_semantics=semantics,
        ),
        cost_estimate=pl.CostEstimate(
            flops=7 * N * C * L,
            transcendentals=C,
            bytes_accessed=2 * N * C * L * 4 + 2 * C * 4,
        ),
    )(x3d, params)

    return out3d.reshape(N, C, H, W)


def _reference(x_nchw, gamma, beta):
    # Pure-JAX reference: training-mode batchnorm (biased var) + ReLU.
    mean = jnp.mean(x_nchw, axis=(0, 2, 3), keepdims=True)
    var = jnp.var(x_nchw, axis=(0, 2, 3), keepdims=True)
    y = (x_nchw - mean) * jax.lax.rsqrt(var + EPS)
    y = y * gamma.reshape(1, -1, 1, 1) + beta.reshape(1, -1, 1, 1)
    return jnp.maximum(y, 0.0)


if __name__ == "__main__":
    key = jax.random.PRNGKey(0)
    N, C, H, W = 1, 256, 14, 14  # matches x111 = torch.randn([1, 256, 14, 14])
    x = jax.random.normal(key, (N, C, H, W), dtype=jnp.float32)

    # Deterministic BatchNorm2d.__init__ defaults: weight=1, bias=0.
    gamma = jnp.ones((C,), dtype=jnp.float32)
    beta = jnp.zeros((C,), dtype=jnp.float32)

    out = jax.block_until_ready(batchnorm_relu(x, gamma, beta))
    ref = jax.block_until_ready(_reference(x, gamma, beta))

    assert out.shape == (N, C, H, W)
    assert jnp.max(jnp.abs(out - ref)) < 1e-4

    print("KERNEL_OK")
</pallas_src>

<mosaic_0001>
module attributes {stable_mosaic.version = 11 : i64} {
  func.func @bn_relu_kernel(%arg0: i32, %arg1: memref<1x256x196xf32, #tpu.memory_space<vmem>>, %arg2: memref<256x2xf32, #tpu.memory_space<vmem>>, %arg3: memref<1x256x196xf32, #tpu.memory_space<vmem>>) attributes {dimension_semantics = [#tpu.dimension_semantics<arbitrary>], iteration_bounds = array<i64: 1>, scalar_prefetch = 0 : i64, scratch_operands = 0 : i64, tpu.core_type = #tpu.core_type<tc>, window_params = [{transform_indices = @transform_0, window_bounds = array<i64: 1, 256, 196>}, {transform_indices = @transform_1, window_bounds = array<i64: 256, 2>}, {transform_indices = @transform_2, window_bounds = array<i64: 1, 256, 196>}]} {
    %c0 = arith.constant 0 : index
    %c0_0 = arith.constant 0 : index
    %c0_1 = arith.constant 0 : index
    %0 = vector.load %arg1[%c0, %c0_0, %c0_1] : memref<1x256x196xf32, #tpu.memory_space<vmem>>, vector<1x256x196xf32>
    %cst = arith.constant dense<0.000000e+00> : vector<256xf32>
    %1 = vector.multi_reduction <add>, %0, %cst [0, 2] : vector<1x256x196xf32> to vector<256xf32>
    %2 = vector.shape_cast %1 : vector<256xf32> to vector<1x256x1xf32>
    %3 = arith.mulf %0, %0 : vector<1x256x196xf32>
    %cst_2 = arith.constant dense<0.000000e+00> : vector<256xf32>
    %4 = vector.multi_reduction <add>, %3, %cst_2 [0, 2] : vector<1x256x196xf32> to vector<256xf32>
    %5 = vector.shape_cast %4 : vector<256xf32> to vector<1x256x1xf32>
    %cst_3 = arith.constant 0.00510204071 : f32
    %6 = vector.broadcast %cst_3 : f32 to vector<1x256x1xf32>
    %7 = arith.mulf %2, %6 : vector<1x256x1xf32>
    %cst_4 = arith.constant 0.00510204071 : f32
    %8 = vector.broadcast %cst_4 : f32 to vector<1x256x1xf32>
    %9 = arith.mulf %5, %8 : vector<1x256x1xf32>
    %10 = arith.mulf %7, %7 : vector<1x256x1xf32>
    %11 = arith.subf %9, %10 : vector<1x256x1xf32>
    %cst_5 = arith.constant 0.000000e+00 : f32
    %12 = vector.broadcast %cst_5 : f32 to vector<1x256x1xf32>
    %13 = arith.maximumf %11, %12 : vector<1x256x1xf32>
    %cst_6 = arith.constant 9.99999974E-6 : f32
    %14 = vector.broadcast %cst_6 : f32 to vector<1x256x1xf32>
    %15 = arith.addf %13, %14 : vector<1x256x1xf32>
    %16 = math.rsqrt %15 : vector<1x256x1xf32>
    %c0_7 = arith.constant 0 : index
    %c0_8 = arith.constant 0 : index
    %17 = vector.load %arg2[%c0_7, %c0_8] : memref<256x2xf32, #tpu.memory_space<vmem>>, vector<256x2xf32>
    %18 = vector.extract_strided_slice %17 {offsets = [0, 0], sizes = [256, 1], strides = [1, 1]} : vector<256x2xf32> to vector<256x1xf32>
    %19 = vector.extract_strided_slice %17 {offsets = [0, 1], sizes = [256, 1], strides = [1, 1]} : vector<256x2xf32> to vector<256x1xf32>
    %20 = vector.shape_cast %18 : vector<256x1xf32> to vector<1x256x1xf32>
    %21 = arith.mulf %20, %16 : vector<1x256x1xf32>
    %22 = arith.mulf %7, %21 : vector<1x256x1xf32>
    %23 = vector.shape_cast %19 : vector<256x1xf32> to vector<1x256x1xf32>
    %24 = arith.subf %23, %22 : vector<1x256x1xf32>
    %c0_9 = arith.constant 0 : index
    %c0_10 = arith.constant 0 : index
    %c0_11 = arith.constant 0 : index
    %25 = vector.load %arg1[%c0_9, %c0_10, %c0_11] : memref<1x256x196xf32, #tpu.memory_space<vmem>>, vector<1x256x196xf32>
    %26 = vector.broadcast %21 : vector<1x256x1xf32> to vector<1x256x196xf32>
    %27 = arith.mulf %25, %26 : vector<1x256x196xf32>
    %28 = vector.broadcast %24 : vector<1x256x1xf32> to vector<1x256x196xf32>
    %29 = arith.addf %27, %28 : vector<1x256x196xf32>
    %cst_12 = arith.constant 0.000000e+00 : f32
    %30 = vector.broadcast %cst_12 : f32 to vector<1x256x196xf32>
    %31 = arith.maximumf %29, %30 : vector<1x256x196xf32>
    %c0_13 = arith.constant 0 : index
    %c0_14 = arith.constant 0 : index
    %c0_15 = arith.constant 0 : index
    %32 = vector.load %arg3[%c0_13, %c0_14, %c0_15] : memref<1x256x196xf32, #tpu.memory_space<vmem>>, vector<1x256x196xf32>
    tpu.vector_store %arg3[%c0_13, %c0_14, %c0_15], %31 {strides = array<i32>} : memref<1x256x196xf32, #tpu.memory_space<vmem>>, vector<1x256x196xf32>,
    return
  }
  func.func @transform_0(%arg0: i32) -> (i32, i32, i32) {
    %c0_i32 = arith.constant 0 : i32
    %c0_i32_0 = arith.constant 0 : i32
    %c0_i32_1 = arith.constant 0 : i32
    return %c0_i32, %arg0, %c0_i32_0 : i32, i32, i32
  }
  func.func @transform_1(%arg0: i32) -> (i32, i32) {
    %c0_i32 = arith.constant 0 : i32
    %c0_i32_0 = arith.constant 0 : i32
    return %arg0, %c0_i32 : i32, i32
  }
  func.func @transform_2(%arg0: i32) -> (i32, i32, i32) {
    %c0_i32 = arith.constant 0 : i32
    %c0_i32_0 = arith.constant 0 : i32
    %c0_i32_1 = arith.constant 0 : i32
    return %c0_i32, %arg0, %c0_i32_0 : i32, i32, i32
  }
}

</mosaic_0001>

<bundles_post_ra>
// kernel: tpu_custom_call.1
= control target key start
LH: loop header
LB: loop body
LE: loop exit
PB: predicated region body
PF: predicated region fallthrough
CT: control target
= control target key end

     0   :  { %vm75_vm0 = vcmask 556032   ;;  %s1887_s27 = smov 1   ;;  %s4430_s0 = inlined_call_operand.vmem [shape: f32[1,256,196], index: 0, kind: input, shape index: {}]   ;;  %s4431_s1 = inlined_call_operand.vmem [shape: f32[256,2], index: 1, kind: input, shape index: {}]   ;;  %s4432_s2 = inlined_call_operand.vmem [shape: f32[1,256,196], index: 2, kind: output, shape index: {}]  }
   0x1   :  { %v1908_v0 = vld [vmem:[%s4430_s0 + $0x40] sm:$0xff]  ;;  %v1913_v1 = vld [vmem:[%s4430_s0 + $0x48] sm:$0xff]  ;;  %v1945_v10 = vld [vmem:[%s4430_s0 + $0x58] sm:$0xff] }
   0x2   :  { %v1918_v2 = vld [vmem:[%s4430_s0 + $0x20] sm:$0xff]  ;;  %v92_v3 = vsel %vm75_vm0, %v1913_v1, 0.0  ;;  %v1925_v4 = vld [vmem:[%s4430_s0 + $0x28] sm:$0xff]  ;;  %v1952_v13 = vld [vmem:[%s4430_s0 + $0x38] sm:$0xff]  ;;  %v96_v16 = vsel %vm75_vm0, %v1945_v10, 0.0 }
   0x3   :  { %v1930_v5 = vld [vmem:[%s4430_s0] sm:$0xff]  ;;  %v1935_v6 = vld [vmem:[%s4430_s0 + $0x8] sm:$0xff]  ;;  %v93_v7 = vadd.f32 %v92_v3, %v1908_v0  ;;  %v84_v8 = vsel %vm75_vm0, %v1925_v4, 0.0  ;;  %v1957_v14 = vld [vmem:[%s4430_s0 + $0x18] sm:$0xff]  ;;  %v88_v18 = vsel %vm75_vm0, %v1952_v13, 0.0 }
   0x4   :  { %v76_v9 = vsel %vm75_vm0, %v1935_v6, 0.0  ;;  %v85_v11 = vadd.f32 %v84_v8, %v1918_v2  ;;  %v1962_v15 = vld [vmem:[%s4430_s0 + $0x50] sm:$0xff]  ;;  %v80_v20 = vsel %vm75_vm0, %v1957_v14, 0.0  ;;  %v1986_v24 = vld [vmem:[%s4430_s0 + $0x88] sm:$0xff]  ;;  %v1991_v25 = vld [vmem:[%s4430_s0 + $0x78] sm:$0xff] }
   0x5   :  { %v77_v12 = vadd.f32 %v76_v9, %v1930_v5  ;;  %94 = vadd.xlane.f32.xlu2 %v93_v7  ;;  %v1969_v17 = vld [vmem:[%s4430_s0 + $0x30] sm:$0xff]  ;;  %v97_v21 = vadd.f32 %v96_v16, %v1962_v15  ;;  %v1996_v26 = vld [vmem:[%s4430_s0 + $0x68] sm:$0xff]  ;;  %v2001_v27 = vld [vmem:[%s4430_s0 + $0x80] sm:$0xff]  ;;  %v108_v28 = vsel %vm75_vm0, %v1986_v24, 0.0  ;;  %v104_v30 = vsel %vm75_vm0, %v1991_v25, 0.0 }
   0x6   :  { %86 = vadd.xlane.f32.xlu1 %v85_v11  ;;  %v1976_v19 = vld [vmem:[%s4430_s0 + $0x10] sm:$0xff]  ;;  %v89_v22 = vadd.f32 %v88_v18, %v1969_v17  ;;  %v2015_v31 = vld [vmem:[%s4430_s0 + $0x60] sm:$0xff]  ;;  %v100_v32 = vsel %vm75_vm0, %v1996_v26, 0.0  ;;  %v109_v33 = vadd.f32 %v108_v28, %v2001_v27  ;;  %v2025_v36 = vld [vmem:[%s4430_s0 + $0xb8] sm:$0xff] }
   0x7   :  { %78 = vadd.xlane.f32.xlu0 %v77_v12  ;;  %v81_v23 = vadd.f32 %v80_v20, %v1976_v19  ;;  %v2008_v29 = vld [vmem:[%s4430_s0 + $0x70] sm:$0xff]  ;;  %v101_v35 = vadd.f32 %v100_v32, %v2015_v31  ;;  %v2030_v37 = vld [vmem:[%s4430_s0 + $0xa8] sm:$0xff]  ;;  %v2035_v38 = vld [vmem:[%s4430_s0 + $0x98] sm:$0xff]  ;;  %v120_v40 = vsel %vm75_vm0, %v2025_v36, 0.0 }
   0x8   :  { %v105_v34 = vadd.f32 %v104_v30, %v2008_v29  ;;  %v2040_v39 = vld [vmem:[%s4430_s0 + $0xb0] sm:$0xff]  ;;  %v2047_v41 = vld [vmem:[%s4430_s0 + $0xa0] sm:$0xff]  ;;  %v116_v42 = vsel %vm75_vm0, %v2030_v37, 0.0  ;;  %v112_v44 = vsel %vm75_vm0, %v2035_v38, 0.0  ;;  %v2064_v48 = vld [vmem:[%s4430_s0 + $0xe8] sm:$0xff] }
   0x9   :  { %v2054_v43 = vld [vmem:[%s4430_s0 + $0x90] sm:$0xff]  ;;  %v121_v45 = vadd.f32 %v120_v40, %v2040_v39  ;;  %v117_v46 = vadd.f32 %v116_v42, %v2047_v41  ;;  %v2069_v49 = vld [vmem:[%s4430_s0 + $0xd8] sm:$0xff]  ;;  %v2074_v50 = vld [vmem:[%s4430_s0 + $0xc8] sm:$0xff]  ;;  %v132_v52 = vsel %vm75_vm0, %v2064_v48, 0.0 }
   0xa   :  { %v113_v47 = vadd.f32 %v112_v44, %v2054_v43  ;;  %v2079_v51 = vld [vmem:[%s4430_s0 + $0xe0] sm:$0xff]  ;;  %v2086_v53 = vld [vmem:[%s4430_s0 + $0xd0] sm:$0xff]  ;;  %v128_v54 = vsel %vm75_vm0, %v2069_v49, 0.0  ;;  %v124_v56 = vsel %vm75_vm0, %v2074_v50, 0.0  ;;  %v2103_v60 = vld [vmem:[%s4430_s0 + $0x118] sm:$0xff] }
   0xb   :  { %v2093_v55 = vld [vmem:[%s4430_s0 + $0xc0] sm:$0xff]  ;;  %v133_v57 = vadd.f32 %v132_v52, %v2079_v51  ;;  %v129_v58 = vadd.f32 %v128_v54, %v2086_v53  ;;  %v2108_v61 = vld [vmem:[%s4430_s0 + $0x108] sm:$0xff]  ;;  %v2113_v62 = vld [vmem:[%s4430_s0 + $0xf8] sm:$0xff]  ;;  %v144_v3 = vsel %vm75_vm0, %v2103_v60, 0.0 }
   0xc   :  { %v125_v59 = vadd.f32 %v124_v56, %v2093_v55  ;;  %v2118_v63 = vld [vmem:[%s4430_s0 + $0x110] sm:$0xff]  ;;  %v2125_v7 = vld [vmem:[%s4430_s0 + $0x100] sm:$0xff]  ;;  %v140_v8 = vsel %vm75_vm0, %v2108_v61, 0.0  ;;  %v136_v11 = vsel %vm75_vm0, %v2113_v62, 0.0  ;;  %v2142_v20 = vld [vmem:[%s4430_s0 + $0x148] sm:$0xff] }
   0xd   :  { %98 = vadd.xlane.f32.xlu2 %v97_v21  ;;  %v2132_v9 = vld [vmem:[%s4430_s0 + $0xf0] sm:$0xff]  ;;  %v145_v12 = vadd.f32 %v144_v3, %v2118_v63  ;;  %v141_v16 = vadd.f32 %v140_v8, %v2125_v7  ;;  %v2147_v21 = vld [vmem:[%s4430_s0 + $0x138] sm:$0xff]  ;;  %v156_v28 = vsel %vm75_vm0, %v2142_v20, 0.0  ;;  %v2203_v54 = vld [vmem:[%s4430_s0 + $0x160] sm:$0xff] }
   0xe   :  { %90 = vadd.xlane.f32.xlu1 %v89_v22  ;;  %v137_v18 = vadd.f32 %v136_v11, %v2132_v9  ;;  %v2152_v22 = vld [vmem:[%s4430_s0 + $0x128] sm:$0xff]  ;;  %v2164_v30 = vld [vmem:[%s4430_s0 + $0x130] sm:$0xff]  ;;  %v152_v32 = vsel %vm75_vm0, %v2147_v21, 0.0  ;;  %v2181_v44 = vld [vmem:[%s4430_s0 + $0x178] sm:$0xff] }
   0xf   :  { %82 = vadd.xlane.f32.xlu0 %v81_v23  ;;  %v2157_v23 = vld [vmem:[%s4430_s0 + $0x140] sm:$0xff]  ;;  %v153_v40 = vadd.f32 %v152_v32, %v2164_v30  ;;  %v168_v52 = vsel %vm75_vm0, %v2181_v44, 0.0  ;;  %v2220_v11 = vld [vmem:[%s4430_s0 + $0x1a8] sm:$0xff]  ;;  %v2242_v32 = vld [vmem:[%s4430_s0 + $0x190] sm:$0xff] }
  0x10   :  { %4473 = vst [vmem:[#allocation4_spill] sm:$0xff] %v2242_v32 }
  0x15   :  { %110 = vadd.xlane.f32.xlu2 %v109_v33  ;;  %v2171_v33 = vld [vmem:[%s4430_s0 + $0x120] sm:$0xff] }
  0x16   :  { %106 = vadd.xlane.f32.xlu1 %v105_v34  ;;  %v148_v34 = vsel %vm75_vm0, %v2152_v22, 0.0 }
  0x17   :  { %102 = vadd.xlane.f32.xlu0 %v101_v35  ;;  %v157_v35 = vadd.f32 %v156_v28, %v2157_v23  ;;  %v149_v42 = vadd.f32 %v148_v34, %v2171_v33  ;;  %v180_v28 = vsel %vm75_vm0, %v2220_v11, 0.0 }
  0x1d   :  { %122 = vadd.xlane.f32.xlu2 %v121_v45  ;;  %v2186_v45 = vld [vmem:[%s4430_s0 + $0x168] sm:$0xff] }
  0x1e   :  { %118 = vadd.xlane.f32.xlu1 %v117_v46  ;;  %v2191_v46 = vld [vmem:[%s4430_s0 + $0x158] sm:$0xff]  ;;  %v164_v56 = vsel %vm75_vm0, %v2186_v45, 0.0 }
  0x1f   :  { %114 = vadd.xlane.f32.xlu0 %v113_v47  ;;  %v2196_v47 = vld [vmem:[%s4430_s0 + $0x170] sm:$0xff]  ;;  %v165_v3 = vadd.f32 %v164_v56, %v2203_v54 }
  0x25   :  { %134 = vadd.xlane.f32.xlu2 %v133_v57  ;;  %v2210_v57 = vld [vmem:[%s4430_s0 + $0x150] sm:$0xff] }
  0x26   :  { %130 = vadd.xlane.f32.xlu1 %v129_v58  ;;  %v160_v58 = vsel %vm75_vm0, %v2191_v46, 0.0 }
  0x27   :  { %126 = vadd.xlane.f32.xlu0 %v125_v59  ;;  %v169_v59 = vadd.f32 %v168_v52, %v2196_v47  ;;  %v161_v8 = vadd.f32 %v160_v58, %v2210_v57  ;;  %v2259_v58 = vld [vmem:[%s4430_s0 + $0x1d8] sm:$0xff] }
  0x28   :  { %4474 = vst [vmem:[#allocation5_spill] sm:$0xff] %v2259_v58 }
  0x2d   :  { %146 = vadd.xlane.f32.xlu2 %v145_v12  ;;  %v2225_v12 = vld [vmem:[%s4430_s0 + $0x198] sm:$0xff] }
  0x2e   :  { %142 = vadd.xlane.f32.xlu1 %v141_v16  ;;  %4471 = vst [vmem:[#allocation2_spill] sm:$0xff] %v2225_v12  ;;  %v2230_v16 = vld [vmem:[%s4430_s0 + $0x188] sm:$0xff]  ;;  %v176_v34 = vsel %vm75_vm0, %v2225_v12, 0.0 }
  0x2f   :  { %138 = vadd.xlane.f32.xlu0 %v137_v18  ;;  %v2235_v18 = vld [vmem:[%s4430_s0 + $0x1a0] sm:$0xff]  ;;  %v177_v52 = vadd.f32 %v176_v34, %v2242_v32  ;;  %v2305_v12 = vld [vmem:[%s4430_s0 + $0x1e8] sm:$0xff] }
  0x30   :  { %4472 = vst [vmem:[#allocation3_spill] sm:$0xff] %v2235_v18  ;;  %v2281_v34 = vld [vmem:[%s4430_s0 + $0x1c0] sm:$0xff] }
  0x31   :  { %4477 = vst [vmem:[#allocation8_spill] sm:$0xff] %v2281_v34 }
  0x35   :  { %158 = vadd.xlane.f32.xlu2 %v157_v35  ;;  %v2249_v35 = vld [vmem:[%s4430_s0 + $0x180] sm:$0xff] }
  0x36   :  { %154 = vadd.xlane.f32.xlu1 %v153_v40  ;;  %v172_v40 = vsel %vm75_vm0, %v2230_v16, 0.0 }
  0x37   :  { %150 = vadd.xlane.f32.xlu0 %v149_v42  ;;  %v181_v42 = vadd.f32 %v180_v28, %v2235_v18  ;;  %v173_v56 = vadd.f32 %v172_v40, %v2249_v35  ;;  %v192_v28 = vsel %vm75_vm0, %v2259_v58, 0.0  ;;  %v205_v18 = vmul.f32 %v1935_v6, %v1935_v6  ;;  %v2313_v6 = vld [vmem:[%s4430_s0 + $0x1f0] sm:$0xff] }
  0x3d   :  { %170 = vadd.xlane.f32.xlu2 %v169_v59  ;;  %v2264_v59 = vld [vmem:[%s4430_s0 + $0x1c8] sm:$0xff] }
  0x3e   :  { %166 = vadd.xlane.f32.xlu1 %v165_v3  ;;  %4475 = vst [vmem:[#allocation6_spill] sm:$0xff] %v2264_v59  ;;  %v2269_v3 = vld [vmem:[%s4430_s0 + $0x1b8] sm:$0xff]  ;;  %v188_v40 = vsel %vm75_vm0, %v2264_v59, 0.0 }
  0x3f   :  { %162 = vadd.xlane.f32.xlu0 %v161_v8  ;;  %v2274_v8 = vld [vmem:[%s4430_s0 + $0x1d0] sm:$0xff]  ;;  %v189_v58 = vadd.f32 %v188_v40, %v2281_v34  ;;  %v2300_v59 = vld [vmem:[%s4430_s0 + $0x1f8] sm:$0xff]  ;;  %v268_v40 = vsel %vm75_vm0, %v205_v18, 0.0  ;;  %v2320_v34 = vld [vmem:[%s4430_s0 + $0x1e0] sm:$0xff] }
  0x40   :  { %4476 = vst [vmem:[#allocation7_spill] sm:$0xff] %v2274_v8 }
  0x41   :  { %4479 = vst [vmem:[#allocation10_spill] sm:$0xff] %v2300_v59 }
  0x45   :  { %182 = vadd.xlane.f32.xlu2 %v181_v42  ;;  %v2288_v42 = vld [vmem:[%s4430_s0 + $0x1b0] sm:$0xff] }
  0x46   :  { %178 = vadd.xlane.f32.xlu1 %v177_v52  ;;  %4478 = vst [vmem:[#allocation9_spill] sm:$0xff] %v2288_v42  ;;  %v184_v52 = vsel %vm75_vm0, %v2269_v3, 0.0 }
  0x47   :  { %174 = vadd.xlane.f32.xlu0 %v173_v56  ;;  %v193_v56 = vadd.f32 %v192_v28, %v2274_v8  ;;  %v185_v32 = vadd.f32 %v184_v52, %v2288_v42  ;;  %v204_v28 = vmul.f32 %v1930_v5, %v1930_v5  ;;  %v200_v52 = vsel %vm75_vm0, %v2300_v59, 0.0 }
  0x48   :  { %v196_v5 = vsel %vm75_vm0, %v2305_v12, 0.0  ;;  %v209_v8 = vmul.f32 %v1925_v4, %v1925_v4  ;;  %v207_v59 = vmul.f32 %v1957_v14, %v1957_v14  ;;  %v210_v42 = vmul.f32 %v1969_v17, %v1969_v17 }
  0x49   :  { %v197_v18 = vadd.f32 %v196_v5, %v2320_v34  ;;  %v217_v17 = vmul.f32 %v1996_v26, %v1996_v26  ;;  %v212_v26 = vmul.f32 %v1908_v0, %v1908_v0  ;;  %v222_v0 = vmul.f32 %v2054_v43, %v2054_v43 }
  0x4a   :  { %v272_v4 = vsel %vm75_vm0, %v207_v59, 0.0  ;;  %v214_v59 = vmul.f32 %v1962_v15, %v1962_v15  ;;  %v219_v15 = vmul.f32 %v1991_v25, %v1991_v25  ;;  %v229_v43 = vmul.f32 %v2074_v50, %v2074_v50 }
  0x4b   :  { %v224_v50 = vmul.f32 %v2047_v41, %v2047_v41  ;;  %v234_v41 = vmul.f32 %v2132_v9, %v2132_v9 }
  0x4d   :  { %194 = vadd.xlane.f32.xlu2 %v193_v56  ;;  %v211_v56 = vmul.f32 %v1952_v13, %v1952_v13  ;;  %v206_v13 = vmul.f32 %v1976_v19, %v1976_v19  ;;  %v216_v19 = vmul.f32 %v2015_v31, %v2015_v31  ;;  %v223_v31 = vmul.f32 %v2035_v38, %v2035_v38 }
  0x4e   :  { %190 = vadd.xlane.f32.xlu1 %v189_v58  ;;  %v269_v58 = vadd.f32 %v268_v40, %v204_v28  ;;  %v208_v28 = vmul.f32 %v1918_v2, %v1918_v2  ;;  %v213_v2 = vmul.f32 %v1913_v1, %v1913_v1  ;;  %v218_v38 = vmul.f32 %v2008_v29, %v2008_v29 }
  0x4f   :  { %186 = vadd.xlane.f32.xlu0 %v185_v32  ;;  %v201_v32 = vadd.f32 %v200_v52, %v2313_v6  ;;  %v280_v40 = vsel %vm75_vm0, %v211_v56, 0.0  ;;  %v276_v52 = vsel %vm75_vm0, %v209_v8, 0.0  ;;  %v292_v8 = vsel %vm75_vm0, %v217_v17, 0.0 }
  0x50   :  { %v281_v5 = vadd.f32 %v280_v40, %v210_v42  ;;  %v277_v14 = vadd.f32 %v276_v52, %v208_v28  ;;  %v221_v28 = vmul.f32 %v1986_v24, %v1986_v24  ;;  %v220_v40 = vmul.f32 %v2001_v27, %v2001_v27 }
  0x51   :  { %v296_v24 = vsel %vm75_vm0, %v219_v15, 0.0  ;;  %v225_v27 = vmul.f32 %v2030_v37, %v2030_v37  ;;  %v228_v29 = vmul.f32 %v2093_v55, %v2093_v55  ;;  %v316_v17 = vsel %vm75_vm0, %v229_v43, 0.0 }
  0x52   :  { %v300_v52 = vsel %vm75_vm0, %v221_v28, 0.0  ;;  %v235_v55 = vmul.f32 %v2113_v62, %v2113_v62  ;;  %v230_v62 = vmul.f32 %v2086_v53, %v2086_v53  ;;  %v237_v53 = vmul.f32 %v2108_v61, %v2108_v61 }
  0x53   :  { %v301_v25 = vadd.f32 %v300_v52, %v220_v40  ;;  %v240_v28 = vmul.f32 %v2171_v33, %v2171_v33  ;;  %v238_v15 = vmul.f32 %v2118_v63, %v2118_v63  ;;  %v247_v63 = vmul.f32 %v2191_v46, %v2191_v46 }
  0x54   :  { %v242_v46 = vmul.f32 %v2164_v30, %v2164_v30  ;;  %v249_v30 = vmul.f32 %v2186_v45, %v2186_v45 }
  0x55   :  { %270 = vadd.xlane.f32.xlu2 %v269_v58  ;;  %v273_v58 = vadd.f32 %v272_v4, %v206_v13  ;;  %v304_v13 = vsel %vm75_vm0, %v223_v31, 0.0  ;;  %v239_v31 = vmul.f32 %v2103_v60, %v2103_v60  ;;  %v332_v60 = vsel %vm75_vm0, %v237_v53, 0.0 }
  0x56   :  { %202 = vadd.xlane.f32.xlu1 %v201_v32  ;;  %v215_v32 = vmul.f32 %v1945_v10, %v1945_v10  ;;  %v284_v10 = vsel %vm75_vm0, %v213_v2, 0.0  ;;  %v305_v4 = vadd.f32 %v304_v13, %v222_v0  ;;  %v317_v2 = vadd.f32 %v316_v17, %v228_v29 }
  0x57   :  { %198 = vadd.xlane.f32.xlu0 %v197_v18  ;;  %v293_v18 = vadd.f32 %v292_v8, %v216_v19  ;;  %v285_v56 = vadd.f32 %v284_v10, %v212_v26  ;;  %v232_v8 = vmul.f32 %v2079_v51, %v2079_v51  ;;  %v328_v26 = vsel %vm75_vm0, %v235_v55, 0.0 }
  0x58   :  { %v288_v42 = vsel %vm75_vm0, %v215_v32, 0.0  ;;  %v329_v9 = vadd.f32 %v328_v26, %v234_v41  ;;  %v241_v51 = vmul.f32 %v2152_v22, %v2152_v22  ;;  %v236_v22 = vmul.f32 %v2125_v7, %v2125_v7  ;;  %v4481_v26 = vld [vmem:[#allocation9_spill] sm:$0xff] }
  0x59   :  { %v289_v1 = vadd.f32 %v288_v42, %v214_v59  ;;  %v233_v59 = vmul.f32 %v2064_v48, %v2064_v48  ;;  %v336_v40 = vsel %vm75_vm0, %v239_v31, 0.0  ;;  %v243_v7 = vmul.f32 %v2147_v21, %v2147_v21 }
  0x5a   :  { %v340_v0 = vsel %vm75_vm0, %v241_v51, 0.0  ;;  %v337_v52 = vadd.f32 %v336_v40, %v238_v15  ;;  %v352_v43 = vsel %vm75_vm0, %v247_v63, 0.0  ;;  %v257_v41 = vmul.f32 %v2220_v11, %v2220_v11  ;;  %v4484_v40 = vld [vmem:[#allocation5_spill] sm:$0xff]  ;;  %v4486_v63 = vld [vmem:[#allocation7_spill] sm:$0xff] }
  0x5b   :  { %v324_v42 = vsel %vm75_vm0, %v233_v59, 0.0  ;;  %v341_v33 = vadd.f32 %v340_v0, %v240_v28 }
  0x5d   :  { %282 = vadd.xlane.f32.xlu2 %v281_v5  ;;  %v297_v5 = vadd.f32 %v296_v24, %v218_v38  ;;  %v333_v24 = vadd.f32 %v332_v60, %v236_v22  ;;  %v265_v22 = vmul.f32 %v2305_v12, %v2305_v12  ;;  %v263_v60 = vmul.f32 %v4484_v40, %v4484_v40 }
  0x5e   :  { %278 = vadd.xlane.f32.xlu1 %v277_v14  ;;  %v227_v14 = vmul.f32 %v2025_v36, %v2025_v36  ;;  %v308_v36 = vsel %vm75_vm0, %v225_v27, 0.0 }
  0x5f   :  { %274 = vadd.xlane.f32.xlu0 %v273_v58  ;;  %v226_v58 = vmul.f32 %v2040_v39, %v2040_v39  ;;  %v309_v19 = vadd.f32 %v308_v36, %v224_v50  ;;  %v231_v39 = vmul.f32 %v2069_v49, %v2069_v49  ;;  %v251_v50 = vmul.f32 %v2181_v44, %v2181_v44 }
  0x60   :  { %v312_v32 = vsel %vm75_vm0, %v227_v14, 0.0  ;;  %v250_v36 = vmul.f32 %v2196_v47, %v2196_v47  ;;  %v356_v44 = vsel %vm75_vm0, %v249_v30, 0.0  ;;  %v259_v47 = vmul.f32 %v2269_v3, %v2269_v3 }
  0x61   :  { %v313_v37 = vadd.f32 %v312_v32, %v226_v58  ;;  %v320_v48 = vsel %vm75_vm0, %v231_v39, 0.0  ;;  %v252_v32 = vmul.f32 %v2249_v35, %v2249_v35 }
  0x65   :  { %294 = vadd.xlane.f32.xlu2 %v293_v18 }
  0x66   :  { %290 = vadd.xlane.f32.xlu1 %v289_v1  ;;  %v325_v1 = vadd.f32 %v324_v42, %v232_v8  ;;  %v4482_v42 = vld [vmem:[#allocation3_spill] sm:$0xff] }
  0x67   :  { %286 = vadd.xlane.f32.xlu0 %v285_v56  ;;  %v321_v56 = vadd.f32 %v320_v48, %v230_v62  ;;  %v258_v62 = vmul.f32 %v4481_v26, %v4481_v26  ;;  %v256_v48 = vmul.f32 %v4482_v42, %v4482_v42 }
  0x6d   :  { %306 = vadd.xlane.f32.xlu2 %v305_v4  ;;  %v245_v4 = vmul.f32 %v2142_v20, %v2142_v20  ;;  %v344_v20 = vsel %vm75_vm0, %v243_v7, 0.0  ;;  %v388_v7 = vsel %vm75_vm0, %v265_v22, 0.0 }
  0x6e   :  { %302 = vadd.xlane.f32.xlu1 %v301_v25  ;;  %v246_v25 = vmul.f32 %v2210_v57, %v2210_v57  ;;  %v345_v17 = vadd.f32 %v344_v20, %v242_v46 }
  0x6f   :  { %298 = vadd.xlane.f32.xlu0 %v297_v5  ;;  %v244_v5 = vmul.f32 %v2157_v23, %v2157_v23  ;;  %v348_v14 = vsel %vm75_vm0, %v245_v4, 0.0  ;;  %v253_v23 = vmul.f32 %v2230_v16, %v2230_v16  ;;  %v248_v16 = vmul.f32 %v2203_v54, %v2203_v54  ;;  %v4480_v54 = vld [vmem:[#allocation2_spill] sm:$0xff] }
  0x70   :  { %v353_v57 = vadd.f32 %v352_v43, %v246_v25  ;;  %v255_v8 = vmul.f32 %v4480_v54, %v4480_v54  ;;  %v262_v4 = vmul.f32 %v4486_v63, %v4486_v63  ;;  %v4487_v25 = vld [vmem:[#allocation8_spill] sm:$0xff] }
  0x71   :  { %v349_v58 = vadd.f32 %v348_v14, %v244_v5  ;;  %v357_v39 = vadd.f32 %v356_v44, %v248_v16  ;;  %v260_v12 = vmul.f32 %v4487_v25, %v4487_v25  ;;  %v384_v5 = vsel %vm75_vm0, %v263_v60, 0.0 }
  0x72   :  { %v368_v11 = vsel %vm75_vm0, %v255_v8, 0.0 }
  0x75   :  { %318 = vadd.xlane.f32.xlu2 %v317_v2  ;;  %v364_v2 = vsel %vm75_vm0, %v253_v23, 0.0 }
  0x76   :  { %314 = vadd.xlane.f32.xlu1 %v313_v37  ;;  %v360_v37 = vsel %vm75_vm0, %v251_v50, 0.0  ;;  %v365_v35 = vadd.f32 %v364_v2, %v252_v32  ;;  %v266_v50 = vmul.f32 %v2313_v6, %v2313_v6 }
  0x77   :  { %310 = vadd.xlane.f32.xlu0 %v309_v19  ;;  %v361_v59 = vadd.f32 %v360_v37, %v250_v36 }
  0x78   :  { %v2401_v10 = vpop.xlane.xlu2 %94 }
  0x79   :  { %v2403_v49 = vpop.xlane.xlu1 %86 }
  0x7a   :  { %v2405_v18 = vpop.xlane.xlu0 %78 }
  0x7b   :  { %v2542_v8 = vmul.f32 0.0051020407, %v2405_v18 }
  0x7d   :  { %330 = vadd.xlane.f32.xlu2 %v329_v9  ;;  %v376_v9 = vsel %vm75_vm0, %v259_v47, 0.0 }
  0x7e   :  { %326 = vadd.xlane.f32.xlu1 %v325_v1  ;;  %v4483_v1 = vld [vmem:[#allocation4_spill] sm:$0xff]  ;;  %v377_v28 = vadd.f32 %v376_v9, %v258_v62  ;;  %v460_v62 = vmul.f32 %v2542_v8, %v2542_v8 }
  0x7f   :  { %322 = vadd.xlane.f32.xlu0 %v321_v56  ;;  %v254_v3 = vmul.f32 %v4483_v1, %v4483_v1  ;;  %v372_v56 = vsel %vm75_vm0, %v257_v41, 0.0 }
  0x80   :  { %v2422_v13 = vpop.xlane.xlu2 %98  ;;  %v373_v15 = vadd.f32 %v372_v56, %v256_v48 }
  0x81   :  { %v2424_v61 = vpop.xlane.xlu1 %90  ;;  %v369_v0 = vadd.f32 %v368_v11, %v254_v3  ;;  %v2551_v3 = vmul.f32 0.0051020407, %v2403_v49  ;;  %v2567_v22 = vmul.f32 0.0051020407, %v2422_v13 }
  0x82   :  { %v2426_v38 = vpop.xlane.xlu0 %82  ;;  %v2554_v56 = vmul.f32 0.0051020407, %v2424_v61 }
  0x83   :  { %v2557_v18 = vmul.f32 0.0051020407, %v2426_v38 }
  0x84   :  { %v463_v49 = vmul.f32 %v2554_v56, %v2554_v56 }
  0x85   :  { %342 = vadd.xlane.f32.xlu2 %v341_v33  ;;  %v4485_v33 = vld [vmem:[#allocation6_spill] sm:$0xff]  ;;  %v461_v13 = vmul.f32 %v2557_v18, %v2557_v18 }
  0x86   :  { %338 = vadd.xlane.f32.xlu1 %v337_v52  ;;  %v261_v52 = vmul.f32 %v4485_v33, %v4485_v33 }
  0x87   :  { %334 = vadd.xlane.f32.xlu0 %v333_v24  ;;  %v264_v24 = vmul.f32 %v2320_v34, %v2320_v34 }
  0x88   :  { %v2443_v27 = vpop.xlane.xlu2 %110  ;;  %v380_v43 = vsel %vm75_vm0, %v261_v52, 0.0 }
  0x89   :  { %v2445_v21 = vpop.xlane.xlu1 %106  ;;  %v389_v34 = vadd.f32 %v388_v7, %v264_v24  ;;  %v2572_v61 = vmul.f32 0.0051020407, %v2443_v27 }
  0x8a   :  { %v2447_v29 = vpop.xlane.xlu0 %102  ;;  %v2575_v38 = vmul.f32 0.0051020407, %v2445_v21 }
  0x8d   :  { %354 = vadd.xlane.f32.xlu2 %v353_v57  ;;  %v385_v57 = vadd.f32 %v384_v5, %v262_v4  ;;  %v465_v5 = vmul.f32 %v2567_v22, %v2567_v22 }
  0x8e   :  { %350 = vadd.xlane.f32.xlu1 %v349_v58  ;;  %v381_v58 = vadd.f32 %v380_v43, %v260_v12 }
  0x8f   :  { %346 = vadd.xlane.f32.xlu0 %v345_v17  ;;  %v4488_v17 = vld [vmem:[#allocation10_spill] sm:$0xff] }
  0x90   :  { %v2464_v19 = vpop.xlane.xlu2 %122  ;;  %v267_v23 = vmul.f32 %v4488_v17, %v4488_v17 }
  0x91   :  { %v2466_v45 = vpop.xlane.xlu1 %118  ;;  %v2584_v24 = vmul.f32 0.0051020407, %v2464_v19  ;;  %v2598_v19 = vmul.f32 %v2572_v61, %v2572_v61 }
  0x92   :  { %v2468_v55 = vpop.xlane.xlu0 %114  ;;  %v392_v30 = vsel %vm75_vm0, %v267_v23, 0.0  ;;  %v2587_v4 = vmul.f32 0.0051020407, %v2466_v45  ;;  %v2602_v45 = vmul.f32 %v2575_v38, %v2575_v38 }
  0x93   :  { %v393_v16 = vadd.f32 %v392_v30, %v266_v50  ;;  %v2590_v21 = vmul.f32 0.0051020407, %v2468_v55 }
  0x94   :  { %v2619_v23 = vmul.f32 %v2587_v4, %v2587_v4 }
  0x95   :  { %366 = vadd.xlane.f32.xlu2 %v365_v35 }
  0x96   :  { %362 = vadd.xlane.f32.xlu1 %v361_v59 }
  0x97   :  { %358 = vadd.xlane.f32.xlu0 %v357_v39 }
  0x98   :  { %v2485_v51 = vpop.xlane.xlu2 %134 }
  0x99   :  { %v2487_v31 = vpop.xlane.xlu1 %130  ;;  %v2605_v55 = vmul.f32 0.0051020407, %v2485_v51  ;;  %v2623_v51 = vmul.f32 %v2590_v21, %v2590_v21 }
  0x9a   :  { %v2489_v53 = vpop.xlane.xlu0 %126  ;;  %v2626_v50 = vmul.f32 0.0051020407, %v2487_v31 }
  0x9b   :  { %4489 = vst [vmem:[#allocation2_spill] sm:$0xff] %v2605_v55  ;;  %v2629_v30 = vmul.f32 0.0051020407, %v2489_v53 }
  0x9c   :  { %4490 = vst [vmem:[#allocation9_spill] sm:$0xff] %v2626_v50 }
  0x9d   :  { %378 = vadd.xlane.f32.xlu2 %v377_v28  ;;  %v2560_v28 = vmul.f32 0.0051020407, %v2401_v10  ;;  %v2578_v10 = vmul.f32 0.0051020407, %v2447_v29  ;;  %4491 = vst [vmem:[#allocation3_spill] sm:$0xff] %v2629_v30 }
  0x9e   :  { %374 = vadd.xlane.f32.xlu1 %v373_v15 }
  0x9f   :  { %370 = vadd.xlane.f32.xlu0 %v369_v0  ;;  %v462_v0 = vmul.f32 %v2551_v3, %v2551_v3  ;;  %v464_v29 = vmul.f32 %v2560_v28, %v2560_v28  ;;  %v2609_v43 = vmul.f32 %v2578_v10, %v2578_v10 }
  0xa0   :  { %v2506_v46 = vpop.xlane.xlu2 %146 }
  0xa1   :  { %v2508_v14 = vpop.xlane.xlu1 %142 }
  0xa2   :  { %v2510_v20 = vpop.xlane.xlu0 %138  ;;  %v2645_v31 = vmul.f32 0.0051020407, %v2508_v14 }
  0xa3   :  { %v2648_v53 = vmul.f32 0.0051020407, %v2510_v20 }
  0xa4   :  { %4493 = vst [vmem:[#allocation5_spill] sm:$0xff] %v2645_v31 }
  0xa5   :  { %390 = vadd.xlane.f32.xlu2 %v389_v34  ;;  %v2613_v34 = vmul.f32 %v2584_v24, %v2584_v24  ;;  %4494 = vst [vmem:[#allocation6_spill] sm:$0xff] %v2648_v53 }
  0xa6   :  { %386 = vadd.xlane.f32.xlu1 %v385_v57 }
  0xa7   :  { %382 = vadd.xlane.f32.xlu0 %v381_v58 }
  0xa8   :  { %v2517_v32 = vpop.xlane.xlu2 %158 }
  0xa9   :  { %v2519_v36 = vpop.xlane.xlu1 %154 }
  0xaa   :  { %v2521_v2 = vpop.xlane.xlu0 %150 }
  0xaf   :  { %394 = vadd.xlane.f32.xlu0 %v393_v16 }
  0xb0   :  { %v2523_v37 = vpop.xlane.xlu2 %170 }
  0xb1   :  { %v2525_v44 = vpop.xlane.xlu1 %166 }
  0xb2   :  { %v2527_v35 = vpop.xlane.xlu0 %162 }
  0xb8   :  { %v2529_v59 = vpop.xlane.xlu2 %182 }
  0xb9   :  { %v2531_v39 = vpop.xlane.xlu1 %178 }
  0xba   :  { %v2533_v6 = vpop.xlane.xlu0 %174 }
  0xc0   :  { %v2535_v47 = vpop.xlane.xlu2 %194 }
  0xc1   :  { %v2537_v41 = vpop.xlane.xlu1 %190 }
  0xc2   :  { %v2539_v54 = vpop.xlane.xlu0 %186 }
  0xc8   :  { %v271_v26 = vpop.xlane.xlu2 %270 }
  0xc9   :  { %v2546_v42 = vpop.xlane.xlu1 %202  ;;  %v428_v48 = vmul.f32 0.0051020407, %v271_v26 }
  0xca   :  { %v2548_v9 = vpop.xlane.xlu0 %198 }
  0xcb   :  { %v492_v1 = vsub.f32 %v428_v48, %v460_v62 }
  0xcd   :  { %v524_v11 = vmax.f32 %v492_v1, 0.0 }
  0xcf   :  { %v2562_v15 = vadd.f32 1e-05, %v524_v11  ;;  %v2639_v11 = vmul.f32 %v2605_v55, %v2605_v55 }
  0xd0   :  { %v283_v40 = vpop.xlane.xlu2 %282 }
  0xd1   :  { %1753 = vrsqrt.f32 %v2562_v15  ;;  %v279_v60 = vpop.xlane.xlu1 %278  ;;  %v431_v33 = vmul.f32 0.0051020407, %v283_v40  ;;  %vm594_vm2 = vweird.f32 %v2562_v15 }
  0xd2   :  { %v275_v52 = vpop.xlane.xlu0 %274  ;;  %v430_v27 = vmul.f32 0.0051020407, %v279_v60  ;;  %v2651_v60 = vmul.f32 0.0051020407, %v2517_v32  ;;  %v2668_v32 = vmul.f32 %v2629_v30, %v2629_v30 }
  0xd3   :  { %v429_v63 = vmul.f32 0.0051020407, %v275_v52  ;;  %v495_v25 = vsub.f32 %v431_v33, %v463_v49  ;;  %v2654_v33 = vmul.f32 0.0051020407, %v2519_v36 }
  0xd4   :  { %v494_v7 = vsub.f32 %v430_v27, %v462_v0  ;;  %v2642_v0 = vmul.f32 0.0051020407, %v2506_v46  ;;  %4495 = vst [vmem:[#allocation7_spill] sm:$0xff] %v2651_v60  ;;  %v2659_v46 = vmul.f32 0.0051020407, %v2521_v2 }
  0xd5   :  { %v493_v12 = vsub.f32 %v429_v63, %v461_v13  ;;  %v527_v62 = vmax.f32 %v495_v25, 0.0  ;;  %4496 = vst [vmem:[#allocation8_spill] sm:$0xff] %v2654_v33  ;;  %v2664_v13 = vmul.f32 %v2626_v50, %v2626_v50  ;;  %v2673_v63 = vmul.f32 0.0051020407, %v2523_v37 }
  0xd6   :  { %v526_v57 = vmax.f32 %v494_v7, 0.0  ;;  %4492 = vst [vmem:[#allocation4_spill] sm:$0xff] %v2642_v0  ;;  %v2693_v37 = vmul.f32 %v2654_v33, %v2654_v33 }
  0xd7   :  { %v525_v58 = vmax.f32 %v493_v12, 0.0  ;;  %v2615_v17 = vpop.eup %1753  ;;  %4497 = vst [vmem:[#allocation10_spill] sm:$0xff] %v2659_v46  ;;  %v2670_v27 = vadd.f32 1e-05, %v527_v62  ;;  %v2677_v12 = vmul.f32 %v2642_v0, %v2642_v0 }
  0xd8   :  { %v589_v16 = vmul.f32 %v2615_v17, %v2562_v15  ;;  %v2633_v26 = vadd.f32 1e-05, %v526_v57  ;;  %v295_v1 = vpop.xlane.xlu2 %294  ;;  %4498 = vst [vmem:[#allocation11_spill] sm:$0xff] %v2673_v63  ;;  %v2681_v57 = vmul.f32 %v2645_v31, %v2645_v31  ;;  %vm595_vm1 = vweird.f32 %v2615_v17 }
  0xd9   :  { %v2635_v48 = vadd.f32 1e-05, %v525_v58  ;;  %v291_v49 = vpop.xlane.xlu1 %290  ;;  %v434_v7 = vmul.f32 0.0051020407, %v295_v1  ;;  %v2685_v58 = vmul.f32 %v2648_v53, %v2648_v53  ;;  %vm596_vm3 = vmor %vm594_vm2, %vm595_vm1  ;;  %vm624_vm10 = vweird.f32 %v2670_v27 }
  0xda   :  { %v287_v40 = vpop.xlane.xlu0 %286  ;;  %v590_v52 = vmul.f32 %v2615_v17, %v589_v16  ;;  %1755 = vrsqrt.f32 %v2633_v26  ;;  %v433_v14 = vmul.f32 0.0051020407, %v291_v49  ;;  %v2689_v16 = vmul.f32 %v2651_v60, %v2651_v60 }
  0xdb   :  { %1757 = vrsqrt.f32 %v2635_v48  ;;  %v432_v20 = vmul.f32 0.0051020407, %v287_v40  ;;  %v2702_v49 = vmul.f32 0.0051020407, %v2525_v44  ;;  %v2705_v40 = vmul.f32 0.0051020407, %v2527_v35 }
  0xdc   :  { %v591_v36 = vmul.f32 0.5, %v590_v52  ;;  %v497_v2 = vsub.f32 %v433_v14, %v465_v5  ;;  %1759 = vrsqrt.f32 %v2670_v27  ;;  %v498_v44 = vsub.f32 %v434_v7, %v2609_v43 }
  0xdd   :  { %v496_v25 = vsub.f32 %v432_v20, %v464_v29  ;;  %v2697_v29 = vmul.f32 %v2659_v46, %v2659_v46  ;;  %4499 = vst [vmem:[#allocation12_spill] sm:$0xff] %v2702_v49  ;;  %v2712_v20 = vmul.f32 %v2673_v63, %v2673_v63  ;;  %v2720_v35 = vmul.f32 0.0051020407, %v2529_v59 }
  0xde   :  { %v592_v5 = vsub.f32 1.5, %v591_v36  ;;  %v529_v62 = vmax.f32 %v497_v2, 0.0  ;;  %4500 = vst [vmem:[#allocation13_spill] sm:$0xff] %v2705_v40  ;;  %v2726_v60 = vmul.f32 0.0051020407, %v2533_v6  ;;  %v2739_v6 = vmul.f32 %v2702_v49, %v2702_v49 }
  0xdf   :  { %v528_v52 = vmax.f32 %v496_v25, 0.0  ;;  %4501 = vst [vmem:[#allocation14_spill] sm:$0xff] %v2720_v35  ;;  %v2723_v25 = vmul.f32 0.0051020407, %v2531_v39  ;;  %v530_v0 = vmax.f32 %v498_v44, 0.0  ;;  %vm614_vm5 = vweird.f32 %v2633_v26 }
  0xe0   :  { %v2699_v1 = vpop.eup %1755  ;;  %v2716_v2 = vadd.f32 1e-05, %v529_v62  ;;  %v307_v46 = vpop.xlane.xlu2 %306  ;;  %4503 = vst [vmem:[#allocation16_spill] sm:$0xff] %v2726_v60  ;;  %v593_v43 = vmul.f32 %v2615_v17, %v592_v5  ;;  %vm604_vm8 = vweird.f32 %v2635_v48 }
  0xe1   :  { %v2708_v14 = vpop.eup %1757  ;;  %v609_v36 = vmul.f32 %v2699_v1, %v2633_v26  ;;  %v303_v33 = vpop.xlane.xlu1 %302  ;;  %4502 = vst [vmem:[#allocation15_spill] sm:$0xff] %v2723_v25  ;;  %v2735_v7 = vadd.f32 1e-05, %v528_v52  ;;  %v437_v53 = vmul.f32 0.0051020407, %v307_v46  ;;  %v2764_v46 = vmul.f32 %v2726_v60, %v2726_v60 }
  0xe2   :  { %v599_v63 = vmul.f32 %v2708_v14, %v2635_v48  ;;  %v299_v31 = vpop.xlane.xlu0 %298  ;;  %1761 = vrsqrt.f32 %v2716_v2  ;;  %v436_v39 = vmul.f32 0.0051020407, %v303_v33  ;;  %v2742_v30 = vpop.eup %1759  ;;  %v2754_v33 = vmul.f32 %v2723_v25, %v2723_v25 }
  0xe3   :  { %v610_v62 = vmul.f32 %v2699_v1, %v609_v36  ;;  %v435_v50 = vmul.f32 0.0051020407, %v299_v31  ;;  %v2746_v36 = vmul.f32 %v2705_v40, %v2705_v40  ;;  %v908_v31 = vld [vmem:[%s4431_s1] sm:$0xff]  ;;  %v597_v44 = vsel %vm596_vm3, %v2615_v17, %v593_v43 }
  0xe4   :  { %v600_v59 = vmul.f32 %v2708_v14, %v599_v63  ;;  %v2750_v63 = vmul.f32 %v2720_v35, %v2720_v35  ;;  %4505 = vst [vmem:[#allocation18_spill] sm:$0xff] %v2754_v33  ;;  %v500_v15 = vsub.f32 %v436_v39, %v2598_v19  ;;  %1763 = vrsqrt.f32 %v2735_v7 }
  0xe5   :  { %v611_v5 = vmul.f32 0.5, %v610_v62  ;;  %v499_v52 = vsub.f32 %v435_v50, %v2602_v45  ;;  %v501_v49 = vsub.f32 %v437_v53, %v2623_v51  ;;  %v619_v39 = vmul.f32 %v2742_v30, %v2670_v27 }
  0xe6   :  { %4504 = vst [vmem:[#allocation17_spill] sm:$0xff] %v2750_v63  ;;  %v601_v25 = vmul.f32 0.5, %v600_v59  ;;  %v532_v35 = vmax.f32 %v500_v15, 0.0  ;;  %v2774_v40 = vadd.f32 1e-05, %v530_v0  ;;  %v2776_v33 = vmul.f32 %v908_v31, %v597_v44 }
  0xe7   :  { %v531_v60 = vmax.f32 %v499_v52, 0.0  ;;  %v2779_v45 = vmul.f32 0.0051020407, %v2535_v47  ;;  %v2782_v17 = vmul.f32 0.0051020407, %v2537_v41  ;;  %v612_v15 = vsub.f32 1.5, %v611_v5 }
  0xe8   :  { %v2770_v19 = vpop.eup %1761  ;;  %4506 = vst [vmem:[#allocation19_spill] sm:$0xff] %v2776_v33  ;;  %v2786_v50 = vadd.f32 1e-05, %v532_v35  ;;  %v2789_v53 = vmul.f32 0.0051020407, %v2539_v54  ;;  %v972_v43 = vmul.f32 %v2776_v33, %v2542_v8  ;;  %v602_v41 = vsub.f32 1.5, %v601_v25  ;;  %v319_v52 = vpop.xlane.xlu2 %318 }
  0xe9   :  { %v315_v62 = vpop.xlane.xlu1 %314  ;;  %v639_v51 = vmul.f32 %v2770_v19, %v2716_v2  ;;  %v2791_v0 = vadd.f32 1e-05, %v531_v60  ;;  %v2796_v47 = vmul.f32 0.0051020407, %v2546_v42  ;;  %v533_v31 = vmax.f32 %v501_v49, 0.0 }
  0xea   :  { %v439_v59 = vmul.f32 0.0051020407, %v315_v62  ;;  %v311_v44 = vpop.xlane.xlu0 %310  ;;  %v2799_v35 = vmul.f32 0.0051020407, %v2548_v9  ;;  %vm615_vm4 = vweird.f32 %v2699_v1  ;;  %v620_v54 = vmul.f32 %v2742_v30, %v619_v39  ;;  %1036 = vrot.lane.b32.xlu1 %v972_v43, %s1887_s27  ;;  %v2805_v8 = vpop.eup %1763  ;;  %v910_v39 = vld [vmem:[%s4431_s1 + $0x10] sm:$0xff] }
  0xeb   :  { %4507 = vst [vmem:[#allocation20_spill] sm:$0xff] %v2796_v47  ;;  %1765 = vrsqrt.f32 %v2774_v40  ;;  %vm605_vm6 = vweird.f32 %v2708_v14  ;;  %v640_v42 = vmul.f32 %v2770_v19, %v639_v51  ;;  %v440_v60 = vmul.f32 0.0051020407, %v319_v52  ;;  %vm2813_vm7 = vmor %vm614_vm5, %vm615_vm4 }
  0xec   :  { %4508 = vst [vmem:[#allocation21_spill] sm:$0xff] %v2799_v35  ;;  %1767 = vrsqrt.f32 %v2786_v50  ;;  %v503_v9 = vsub.f32 %v439_v59, %v2613_v34  ;;  %v438_v49 = vmul.f32 0.0051020407, %v311_v44  ;;  %v2818_v5 = vadd.f32 1e-05, %v533_v31  ;;  %vm2825_vm9 = vmor %vm604_vm8, %vm605_vm6 }
  0xed   :  { %1769 = vrsqrt.f32 %v2791_v0  ;;  %v613_v26 = vmul.f32 %v2699_v1, %v612_v15  ;;  %v603_v62 = vmul.f32 %v2708_v14, %v602_v41  ;;  %v621_v51 = vmul.f32 0.5, %v620_v54  ;;  %v909_v15 = vld [vmem:[%s4431_s1 + $0x8] sm:$0xff] }
  0xee   :  { %v629_v43 = vmul.f32 %v2805_v8, %v2735_v7  ;;  %v535_v59 = vmax.f32 %v503_v9, 0.0  ;;  %v502_v48 = vsub.f32 %v438_v49, %v2619_v23  ;;  %v641_v52 = vmul.f32 0.5, %v640_v42 }
  0xef   :  { %v617_v41 = vsel %vm2813_vm7, %v2699_v1, %v613_v26  ;;  %v607_v44 = vsel %vm2825_vm9, %v2708_v14, %v603_v62  ;;  %v504_v23 = vsub.f32 %v440_v60, %v2668_v32  ;;  %v2852_v42 = vmul.f32 %v2779_v45, %v2779_v45 }
  0xf0   :  { %v2843_v9 = vadd.f32 1e-05, %v535_v59  ;;  %v534_v49 = vmax.f32 %v502_v48, 0.0  ;;  %v2846_v63 = vmul.f32 %v910_v39, %v617_v41  ;;  %1771 = vrsqrt.f32 %v2818_v5  ;;  %v331_v59 = vpop.xlane.xlu2 %330 }
  0xf1   :  { %v327_v31 = vpop.xlane.xlu1 %326  ;;  %v2841_v33 = vpop.eup %1765  ;;  %v2855_v1 = vmul.f32 %v909_v15, %v607_v44  ;;  %v2862_v32 = vmul.f32 %v2782_v17, %v2782_v17  ;;  %v2866_v60 = vmul.f32 %v2789_v53, %v2789_v53  ;;  %v630_v26 = vmul.f32 %v2805_v8, %v629_v43 }
  0xf2   :  { %v442_v54 = vmul.f32 0.0051020407, %v327_v31  ;;  %4513 = vst [vmem:[#allocation22_spill] sm:$0xff] %v2846_v63  ;;  %v2848_v55 = vpop.eup %1767  ;;  %1773 = vrsqrt.f32 %v2843_v9  ;;  %v2872_v39 = vmul.f32 %v2796_v47, %v2796_v47  ;;  %v622_v62 = vsub.f32 1.5, %v621_v51  ;;  %v323_v41 = vpop.xlane.xlu0 %322 }
  0xf3   :  { %4514 = vst [vmem:[#allocation23_spill] sm:$0xff] %v2855_v1  ;;  %v2858_v25 = vpop.eup %1769  ;;  %v649_v34 = vmul.f32 %v2841_v33, %v2774_v40  ;;  %v642_v48 = vsub.f32 1.5, %v641_v52  ;;  %v536_v15 = vmax.f32 %v504_v23, 0.0  ;;  %v2880_v31 = vadd.f32 1e-05, %v534_v49 }
  0xf4   :  { %v506_v14 = vsub.f32 %v442_v54, %v2639_v11  ;;  %v2876_v11 = vmul.f32 %v2799_v35, %v2799_v35  ;;  %v974_v43 = vmul.f32 %v2846_v63, %v2551_v3  ;;  %v669_v44 = vmul.f32 %v2848_v55, %v2786_v50 }
  0xf5   :  { %v659_v54 = vmul.f32 %v2858_v25, %v2791_v0  ;;  %v973_v51 = vmul.f32 %v2855_v1, %v2557_v18  ;;  %vm625_vm11 = vweird.f32 %v2742_v30  ;;  %v631_v52 = vmul.f32 0.5, %v630_v26 }
  0xf6   :  { %v538_v47 = vmax.f32 %v506_v14, 0.0  ;;  %1040 = vrot.lane.b32.xlu0 %v974_v43, %s1887_s27  ;;  %v443_v23 = vmul.f32 0.0051020407, %v331_v59  ;;  %v2893_v3 = vpop.eup %1771  ;;  %vm645_vm12 = vweird.f32 %v2770_v19  ;;  %1775 = vrsqrt.f32 %v2880_v31  ;;  %vm2910_vm14 = vmor %vm624_vm10, %vm625_vm11 }
  0xf7   :  { %1038 = vrot.lane.b32.xlu2 %v973_v51, %s1887_s27  ;;  %v441_v18 = vmul.f32 0.0051020407, %v323_v41  ;;  %vm644_vm13 = vweird.f32 %v2716_v2  ;;  %v650_v26 = vmul.f32 %v2841_v33, %v649_v34  ;;  %v643_v43 = vmul.f32 %v2770_v19, %v642_v48 }
  0xf8   :  { %v2898_v49 = vadd.f32 1e-05, %v538_v47  ;;  %v2900_v14 = vpop.eup %1773  ;;  %v623_v59 = vmul.f32 %v2742_v30, %v622_v62  ;;  %vm634_vm15 = vweird.f32 %v2735_v7  ;;  %v670_v47 = vmul.f32 %v2848_v55, %v669_v44  ;;  %v913_v62 = vld [vmem:[%s4431_s1 + $0x28] sm:$0xff]  ;;  %vm646_vm1 = vmor %vm644_vm13, %vm645_vm12 }
  0xf9   :  { %v660_v2 = vmul.f32 %v2858_v25, %v659_v54  ;;  %v2917_v41 = vadd.f32 1e-05, %v536_v15  ;;  %v632_v27 = vsub.f32 1.5, %v631_v52  ;;  %v679_v34 = vmul.f32 %v2893_v3, %v2818_v5  ;;  %v911_v52 = vld [vmem:[%s4431_s1 + $0x18] sm:$0xff] }
  0xfa   :  { %v699_v48 = vmul.f32 %v2900_v14, %v2843_v9  ;;  %v507_v44 = vsub.f32 %v443_v23, %v2685_v58  ;;  %1777 = vrsqrt.f32 %v2898_v49  ;;  %v505_v15 = vsub.f32 %v441_v18, %v2664_v13  ;;  %v339_v13 = vpop.xlane.xlu1 %338 }
  0xfb   :  { %v647_v54 = vsel %vm646_vm1, %v2770_v19, %v643_v43  ;;  %v627_v51 = vsel %vm2910_vm14, %v2742_v30, %v623_v59  ;;  %v651_v1 = vmul.f32 0.5, %v650_v26  ;;  %vm654_vm2 = vweird.f32 %v2774_v40 }
  0xfc   :  { %vm655_vm3 = vweird.f32 %v2841_v33  ;;  %vm635_vm4 = vweird.f32 %v2805_v8  ;;  %v2941_v58 = vmul.f32 %v913_v62, %v647_v54  ;;  %v2943_v23 = vpop.eup %1775  ;;  %v671_v19 = vmul.f32 0.5, %v670_v47  ;;  %v912_v47 = vld [vmem:[%s4431_s1 + $0x20] sm:$0xff] }
  0xfd   :  { %v661_v18 = vmul.f32 0.5, %v660_v2  ;;  %1779 = vrsqrt.f32 %v2917_v41  ;;  %v537_v30 = vmax.f32 %v505_v15, 0.0  ;;  %v539_v63 = vmax.f32 %v507_v44, 0.0  ;;  %vm636_vm6 = vmor %vm634_vm15, %vm635_vm4 }
  0xfe   :  { %4517 = vst [vmem:[#allocation24_spill] sm:$0xff] %v2941_v58  ;;  %v977_v26 = vmul.f32 %v2941_v58, %v2567_v22  ;;  %v2948_v43 = vmul.f32 %v911_v52, %v627_v51  ;;  %v633_v59 = vmul.f32 %v2805_v8, %v632_v27  ;;  %vm674_vm5 = vweird.f32 %v2786_v50  ;;  %vm2993_vm10 = vmor %vm654_vm2, %vm655_vm3 }
  0xff   :  { %v680_v62 = vmul.f32 %v2893_v3, %v679_v34  ;;  %v700_v54 = vmul.f32 %v2900_v14, %v699_v48  ;;  %v445_v2 = vmul.f32 0.0051020407, %v339_v13  ;;  %v652_v15 = vsub.f32 1.5, %v651_v1  ;;  %v343_v34 = vpop.xlane.xlu2 %342  ;;  %v335_v48 = vpop.xlane.xlu0 %334 }
 0x100   :  { %4518 = vst [vmem:[#allocation25_spill] sm:$0xff] %v2948_v43  ;;  %vm664_vm7 = vweird.f32 %v2791_v0  ;;  %v689_v22 = vmul.f32 %v2943_v23, %v2880_v31  ;;  %1046 = vrot.lane.b32.xlu0 %v977_v26, %s1887_s27  ;;  %v975_v27 = vmul.f32 %v2948_v43, %v2554_v56  ;;  %v2967_v44 = vpop.eup %1777  ;;  %v672_v1 = vsub.f32 1.5, %v671_v19 }
 0x101   :  { %vm675_vm8 = vweird.f32 %v2848_v55  ;;  %v2970_v51 = vadd.f32 1e-05, %v537_v30  ;;  %v637_v7 = vsel %vm636_vm6, %v2805_v8, %v633_v59  ;;  %v662_v52 = vsub.f32 1.5, %v661_v18 }
 0x102   :  { %v2973_v13 = vadd.f32 1e-05, %v539_v63  ;;  %1042 = vrot.lane.b32.xlu2 %v975_v27, %s1887_s27  ;;  %v2976_v26 = vmul.f32 %v912_v47, %v637_v7  ;;  %v509_v56 = vsub.f32 %v445_v2, %v2677_v12  ;;  %v2981_v58 = vmul.f32 0.5, %v680_v62  ;;  %vm3006_vm12 = vmor %vm674_vm5, %vm675_vm8 }
 0x103   :  { %v2979_v43 = vpop.eup %1779  ;;  %vm685_vm9 = vweird.f32 %v2893_v3  ;;  %v701_v19 = vmul.f32 0.5, %v700_v54  ;;  %v446_v30 = vmul.f32 0.0051020407, %v343_v34  ;;  %v444_v35 = vmul.f32 0.0051020407, %v335_v48  ;;  %v3032_v34 = vld [vmem:[%s4431_s1 + $0x30] sm:$0xff]  ;;  %v351_v48 = vpop.xlane.xlu1 %350 }
 0x104   :  { %v690_v8 = vmul.f32 %v2943_v23, %v689_v22  ;;  %v729_v18 = vmul.f32 %v2967_v44, %v2898_v49  ;;  %v976_v63 = vmul.f32 %v2976_v26, %v2560_v28  ;;  %v541_v59 = vmax.f32 %v509_v56, 0.0  ;;  %4523 = vst [vmem:[#allocation26_spill] sm:$0xff] %v3032_v34 }
 0x105   :  { %vm684_vm11 = vweird.f32 %v2818_v5  ;;  %1781 = vrsqrt.f32 %v2970_v51  ;;  %v508_v62 = vsub.f32 %v444_v35, %v2681_v57  ;;  %v673_v54 = vmul.f32 %v2848_v55, %v672_v1  ;;  %v3019_v35 = vld [vmem:[%s4431_s1 + $0x40] sm:$0xff] }
 0x106   :  { %v653_v47 = vmul.f32 %v2841_v33, %v652_v15  ;;  %vm665_vm13 = vweird.f32 %v2858_v25  ;;  %v709_v40 = vmul.f32 %v2979_v43, %v2917_v41  ;;  %1044 = vrot.lane.b32.xlu1 %v976_v63, %s1887_s27  ;;  %v3014_v57 = vadd.f32 1e-05, %v541_v59  ;;  %vm3083_vm4 = vmor %vm684_vm11, %vm685_vm9 }
 0x107   :  { %v663_v50 = vmul.f32 %v2858_v25, %v662_v52  ;;  %v510_v2 = vsub.f32 %v446_v30, %v2697_v29  ;;  %v540_v15 = vmax.f32 %v508_v62, 0.0  ;;  %v677_v22 = vsel %vm3006_vm12, %v2848_v55, %v673_v54  ;;  %vm3041_vm1 = vmor %vm664_vm7, %vm665_vm13  ;;  %v3053_v52 = vld [vmem:[%s4431_s1 + $0x38] sm:$0xff]  ;;  %v355_v30 = vpop.xlane.xlu2 %354  ;;  %v3111_v55 = vld [vmem:[%s4431_s1 + $0x48] sm:$0xff] }
 0x108   :  { %v657_v27 = vsel %vm2993_vm10, %v2841_v33, %v653_v47  ;;  %v682_v1 = vsub.f32 1.5, %v2981_v58  ;;  %vm704_vm14 = vweird.f32 %v2843_v9  ;;  %vm705_vm15 = vweird.f32 %v2900_v14  ;;  %4526 = vst [vmem:[#allocation27_spill] sm:$0xff] %v3053_v52 }
 0x109   :  { %v691_v29 = vmul.f32 0.5, %v690_v8  ;;  %v702_v33 = vsub.f32 1.5, %v701_v19  ;;  %v730_v7 = vmul.f32 %v2967_v44, %v729_v18  ;;  %1783 = vrsqrt.f32 %v2973_v13  ;;  %v347_v8 = vpop.xlane.xlu0 %346  ;;  %vm706_vm5 = vmor %vm704_vm14, %vm705_vm15  ;;  %4529 = vst [vmem:[#allocation28_spill] sm:$0xff] %v3111_v55 }
 0x10a   :  { %v3048_v58 = vmul.f32 %v3019_v35, %v677_v22  ;;  %vm694_vm2 = vweird.f32 %v2880_v31  ;;  %1785 = vrsqrt.f32 %v3014_v57  ;;  %v3058_v0 = vmul.f32 %v3032_v34, %v657_v27  ;;  %v3095_v22 = vld [vmem:[%s4431_s1 + $0x58] sm:$0xff]  ;;  %v3155_v31 = vld [vmem:[%s4431_s1 + $0x50] sm:$0xff] }
 0x10b   :  { %v667_v56 = vsel %vm3041_vm1, %v2858_v25, %v663_v50  ;;  %v448_v19 = vmul.f32 0.0051020407, %v351_v48  ;;  %v3063_v18 = vpop.eup %1781  ;;  %v710_v63 = vmul.f32 %v2979_v43, %v709_v40  ;;  %v542_v59 = vmax.f32 %v510_v2, 0.0  ;;  %4532 = vst [vmem:[#allocation29_spill] sm:$0xff] %v3155_v31 }
 0x10c   :  { %v3066_v12 = vadd.f32 1e-05, %v540_v15  ;;  %v980_v62 = vmul.f32 %v3048_v58, %v2572_v61  ;;  %v692_v54 = vsub.f32 1.5, %v691_v29  ;;  %vm695_vm3 = vweird.f32 %v2943_v23 }
 0x10d   :  { %v978_v47 = vmul.f32 %v3058_v0, %v2578_v10  ;;  %v3074_v25 = vmul.f32 %v3053_v52, %v667_v56  ;;  %v512_v28 = vsub.f32 %v448_v19, %v2689_v16  ;;  %v449_v40 = vmul.f32 0.0051020407, %v355_v30  ;;  %vm3139_vm8 = vmor %vm694_vm2, %vm695_vm3 }
 0x10e   :  { %1052 = vrot.lane.b32.xlu0 %v980_v62, %s1887_s27  ;;  %v447_v50 = vmul.f32 0.0051020407, %v347_v8  ;;  %v703_v2 = vmul.f32 %v2900_v14, %v702_v33  ;;  %v731_v10 = vmul.f32 0.5, %v730_v7  ;;  %v719_v15 = vmul.f32 %v3063_v18, %v2970_v51 }
 0x10f   :  { %1048 = vrot.lane.b32.xlu2 %v978_v47, %s1887_s27  ;;  %v979_v16 = vmul.f32 %v3074_v25, %v2575_v38  ;;  %v683_v5 = vmul.f32 %v2893_v3, %v682_v1  ;;  %v3098_v27 = vpop.eup %1783  ;;  %v3104_v48 = vadd.f32 1e-05, %v542_v59  ;;  %1787 = vrsqrt.f32 %v3066_v12 }
 0x110   :  { %v544_v29 = vmax.f32 %v512_v28, 0.0  ;;  %v513_v38 = vsub.f32 %v449_v40, %v2746_v36  ;;  %v3113_v1 = vpop.eup %1785  ;;  %v511_v33 = vsub.f32 %v447_v50, %v2693_v37  ;;  %v707_v9 = vsel %vm706_vm5, %v2900_v14, %v703_v2  ;;  %v363_v40 = vpop.xlane.xlu1 %362 }
 0x111   :  { %1050 = vrot.lane.b32.xlu1 %v979_v16, %s1887_s27  ;;  %v687_v7 = vsel %vm3083_vm4, %v2893_v3, %v683_v5  ;;  %v693_v56 = vmul.f32 %v2943_v23, %v692_v54  ;;  %v711_v36 = vmul.f32 0.5, %v710_v63  ;;  %v3125_v8 = vmul.f32 %v3095_v22, %v707_v9  ;;  %v367_v16 = vpop.xlane.xlu2 %366  ;;  %v359_v5 = vpop.xlane.xlu0 %358 }
 0x112   :  { %v3122_v19 = vadd.f32 1e-05, %v544_v29  ;;  %v545_v30 = vmax.f32 %v513_v38, 0.0  ;;  %v739_v59 = vmul.f32 %v3098_v27, %v2973_v13  ;;  %v720_v37 = vmul.f32 %v3063_v18, %v719_v15 }
 0x113   :  { %v543_v62 = vmax.f32 %v511_v33, 0.0  ;;  %v3131_v14 = vmul.f32 %v3111_v55, %v687_v7  ;;  %vm714_vm6 = vweird.f32 %v2917_v41  ;;  %vm715_vm7 = vweird.f32 %v2979_v43  ;;  %v3258_v41 = vld [vmem:[%s4431_s1 + $0x68] sm:$0xff] }
 0x114   :  { %v759_v63 = vmul.f32 %v3113_v1, %v3014_v57  ;;  %1789 = vrsqrt.f32 %v3104_v48  ;;  %v732_v54 = vsub.f32 1.5, %v731_v10  ;;  %v3147_v47 = vadd.f32 1e-05, %v545_v30  ;;  %vm3184_vm11 = vmor %vm714_vm6, %vm715_vm7  ;;  %4538 = vst [vmem:[#allocation31_spill] sm:$0xff] %v3258_v41 }
 0x115   :  { %1791 = vrsqrt.f32 %v3122_v19  ;;  %v697_v28 = vsel %vm3139_vm8, %v2943_v23, %v693_v56  ;;  %v3157_v50 = vpop.eup %1787  ;;  %v712_v2 = vsub.f32 1.5, %v711_v36  ;;  %v3159_v61 = vadd.f32 1e-05, %v543_v62 }
 0x116   :  { %v983_v10 = vmul.f32 %v3125_v8, %v2584_v24  ;;  %v981_v15 = vmul.f32 %v3131_v14, %v2590_v21  ;;  %vm734_vm9 = vweird.f32 %v2898_v49  ;;  %vm735_vm10 = vweird.f32 %v2967_v44 }
 0x117   :  { %v740_v23 = vmul.f32 %v3098_v27, %v739_v59  ;;  %v721_v29 = vmul.f32 0.5, %v720_v37  ;;  %v760_v38 = vmul.f32 %v3113_v1, %v759_v63  ;;  %1793 = vrsqrt.f32 %v3147_v47  ;;  %vm3199_vm12 = vmor %vm734_vm9, %vm735_vm10 }
 0x118   :  { %1058 = vrot.lane.b32.xlu0 %v983_v10, %s1887_s27  ;;  %1054 = vrot.lane.b32.xlu2 %v981_v15, %s1887_s27  ;;  %v3173_v24 = vmul.f32 %v3155_v31, %v697_v28  ;;  %v451_v21 = vmul.f32 0.0051020407, %v363_v40  ;;  %v749_v33 = vmul.f32 %v3157_v50, %v3066_v12  ;;  %v452_v9 = vmul.f32 0.0051020407, %v367_v16  ;;  %v375_v30 = vpop.xlane.xlu1 %374 }
 0x119   :  { %v450_v7 = vmul.f32 0.0051020407, %v359_v5  ;;  %v733_v56 = vmul.f32 %v2967_v44, %v732_v54  ;;  %1795 = vrsqrt.f32 %v3159_v61  ;;  %v713_v62 = vmul.f32 %v2979_v43, %v712_v2 }
 0x11a   :  { %v3178_v36 = vpop.eup %1789  ;;  %v982_v59 = vmul.f32 %v3173_v24, %v2587_v4  ;;  %v515_v37 = vsub.f32 %v451_v21, %v2712_v20  ;;  %v722_v63 = vsub.f32 1.5, %v721_v29  ;;  %vm724_vm13 = vweird.f32 %v2970_v51  ;;  %v3209_v20 = vld [vmem:[%s4431_s1 + $0x70] sm:$0xff] }
 0x11b   :  { %v3193_v3 = vpop.eup %1791  ;;  %v516_v54 = vsub.f32 %v452_v9, %v2764_v46  ;;  %v514_v4 = vsub.f32 %v450_v7, %v2739_v6  ;;  %v3211_v28 = vmul.f32 0.5, %v740_v23  ;;  %v737_v40 = vsel %vm3199_vm12, %v2967_v44, %v733_v56  ;;  %v3223_v6 = vld [vmem:[%s4431_s1 + $0x60] sm:$0xff] }
 0x11c   :  { %1056 = vrot.lane.b32.xlu1 %v982_v59, %s1887_s27  ;;  %v547_v49 = vmax.f32 %v515_v37, 0.0  ;;  %v717_v46 = vsel %vm3184_vm11, %v2979_v43, %v713_v62  ;;  %4537 = vst [vmem:[#allocation30_spill] sm:$0xff] %v3223_v6  ;;  %v761_v2 = vmul.f32 0.5, %v760_v38  ;;  %v750_v10 = vmul.f32 %v3157_v50, %v749_v33 }
 0x11d   :  { %v548_v15 = vmax.f32 %v516_v54, 0.0  ;;  %v546_v16 = vmax.f32 %v514_v4, 0.0  ;;  %v3226_v5 = vpop.eup %1793  ;;  %v769_v23 = vmul.f32 %v3178_v36, %v3104_v48  ;;  %v789_v44 = vmul.f32 %v3193_v3, %v3122_v19  ;;  %v371_v54 = vpop.xlane.xlu0 %370 }
 0x11e   :  { %v3232_v29 = vadd.f32 1e-05, %v547_v49  ;;  %v3235_v43 = vmul.f32 %v3209_v20, %v737_v40  ;;  %vm725_vm14 = vweird.f32 %v3063_v18  ;;  %vm764_vm15 = vweird.f32 %v3014_v57  ;;  %v4539_v49 = vld [vmem:[#allocation2_spill] sm:$0xff] }
 0x11f   :  { %v3240_v38 = vmul.f32 %v3223_v6, %v717_v46  ;;  %v723_v21 = vmul.f32 %v3063_v18, %v722_v63  ;;  %v3243_v33 = vpop.eup %1795  ;;  %v742_v9 = vsub.f32 1.5, %v3211_v28  ;;  %v3247_v7 = vadd.f32 1e-05, %v548_v15  ;;  %v379_v63 = vpop.xlane.xlu2 %378  ;;  %vm726_vm3 = vmor %vm724_vm13, %vm725_vm14 }
 0x120   :  { %1797 = vrsqrt.f32 %v3232_v29  ;;  %v3249_v56 = vadd.f32 1e-05, %v546_v16  ;;  %vm745_vm1 = vweird.f32 %v3098_v27  ;;  %v762_v59 = vsub.f32 1.5, %v761_v2  ;;  %v4540_v2 = vld [vmem:[#allocation3_spill] sm:$0xff] }
 0x121   :  { %vm765_vm2 = vweird.f32 %v3113_v1  ;;  %v751_v37 = vmul.f32 0.5, %v750_v10  ;;  %v799_v62 = vmul.f32 %v3226_v5, %v3147_v47  ;;  %v770_v4 = vmul.f32 %v3178_v36, %v769_v23 }
 0x122   :  { %v790_v28 = vmul.f32 %v3193_v3, %v789_v44  ;;  %1799 = vrsqrt.f32 %v3249_v56  ;;  %v986_v40 = vmul.f32 %v3235_v43, %v4539_v49  ;;  %vm744_vm4 = vweird.f32 %v2973_v13  ;;  %vm3291_vm6 = vmor %vm764_vm15, %vm765_vm2  ;;  %v3358_v13 = vld [vmem:[%s4431_s1 + $0x80] sm:$0xff] }
 0x123   :  { %v779_v46 = vmul.f32 %v3243_v33, %v3159_v61  ;;  %v984_v10 = vmul.f32 %v3240_v38, %v4540_v2  ;;  %v727_v51 = vsel %vm726_vm3, %v3063_v18, %v723_v21  ;;  %v454_v15 = vmul.f32 0.0051020407, %v375_v30  ;;  %v4541_v2 = vld [vmem:[#allocation17_spill] sm:$0xff]  ;;  %vm3341_vm9 = vmor %vm744_vm4, %vm745_vm1 }
 0x124   :  { %vm754_vm5 = vweird.f32 %v3066_v12  ;;  %1801 = vrsqrt.f32 %v3247_v7  ;;  %1064 = vrot.lane.b32.xlu0 %v986_v40, %s1887_s27  ;;  %v3279_v16 = vmul.f32 %v3258_v41, %v727_v51  ;;  %v455_v23 = vmul.f32 0.0051020407, %v379_v63 }
 0x125   :  { %v453_v44 = vmul.f32 0.0051020407, %v371_v54  ;;  %v752_v49 = vsub.f32 1.5, %v751_v37  ;;  %v800_v6 = vmul.f32 %v3226_v5, %v799_v62  ;;  %1060 = vrot.lane.b32.xlu2 %v984_v10, %s1887_s27  ;;  %v518_v31 = vsub.f32 %v454_v15, %v4541_v2  ;;  %v4544_v37 = vld [vmem:[#allocation9_spill] sm:$0xff]  ;;  %v4545_v54 = vld [vmem:[#allocation18_spill] sm:$0xff]  ;;  %v3310_v15 = vld [vmem:[%s4431_s1 + $0x88] sm:$0xff] }
 0x126   :  { %v763_v18 = vmul.f32 %v3113_v1, %v762_v59  ;;  %v3285_v21 = vpop.eup %1797  ;;  %vm755_vm7 = vweird.f32 %v3157_v50  ;;  %v985_v62 = vmul.f32 %v3279_v16, %v4544_v37  ;;  %v519_v63 = vsub.f32 %v455_v23, %v2866_v60  ;;  %4546 = vst [vmem:[#allocation2_spill] sm:$0xff] %v3310_v15 }
 0x127   :  { %v517_v40 = vsub.f32 %v453_v44, %v4545_v54  ;;  %v3300_v59 = vmul.f32 0.5, %v770_v4  ;;  %v819_v10 = vmul.f32 %v3285_v21, %v3232_v29  ;;  %v550_v51 = vmax.f32 %v518_v31, 0.0  ;;  %vm756_vm12 = vmor %vm754_vm5, %vm755_vm7 }
 0x128   :  { %v767_v57 = vsel %vm3291_vm6, %v3113_v1, %v763_v18  ;;  %v3312_v2 = vpop.eup %1799  ;;  %v791_v60 = vmul.f32 0.5, %v790_v28  ;;  %v780_v23 = vmul.f32 %v3243_v33, %v779_v46  ;;  %1062 = vrot.lane.b32.xlu1 %v985_v62, %s1887_s27  ;;  %v551_v4 = vmax.f32 %v519_v63, 0.0  ;;  %v4551_v62 = vld [vmem:[#allocation5_spill] sm:$0xff] }
 0x129   :  { %v549_v44 = vmax.f32 %v517_v40, 0.0  ;;  %v3316_v37 = vmul.f32 0.5, %v800_v6  ;;  %v3318_v31 = vadd.f32 1e-05, %v550_v51  ;;  %v743_v1 = vmul.f32 %v3098_v27, %v742_v9 }
 0x12a   :  { %v753_v18 = vmul.f32 %v3157_v50, %v752_v49  ;;  %v3322_v30 = vpop.eup %1801  ;;  %v820_v54 = vmul.f32 %v3285_v21, %v819_v10  ;;  %v3325_v41 = vadd.f32 1e-05, %v551_v4  ;;  %v3330_v46 = vmul.f32 %v3310_v15, %v767_v57  ;;  %v387_v49 = vpop.xlane.xlu1 %386 }
 0x12b   :  { %v3327_v28 = vadd.f32 1e-05, %v549_v44  ;;  %v772_v6 = vsub.f32 1.5, %v3300_v59  ;;  %vm794_vm8 = vweird.f32 %v3122_v19  ;;  %v809_v9 = vmul.f32 %v3312_v2, %v3249_v56  ;;  %v3353_v59 = vld [vmem:[%s4431_s1 + $0x78] sm:$0xff]  ;;  %v391_v10 = vpop.xlane.xlu2 %390  ;;  %v383_v4 = vpop.xlane.xlu0 %382  ;;  %v3417_v19 = vld [vmem:[%s4431_s1 + $0xa0] sm:$0xff] }
 0x12c   :  { %1803 = vrsqrt.f32 %v3318_v31  ;;  %vm775_vm10 = vweird.f32 %v3178_v36  ;;  %v792_v63 = vsub.f32 1.5, %v791_v60  ;;  %vm795_vm11 = vweird.f32 %v3193_v3  ;;  %v4549_v60 = vld [vmem:[#allocation4_spill] sm:$0xff] }
 0x12d   :  { %v3347_v40 = vmul.f32 0.5, %v780_v23  ;;  %1805 = vrsqrt.f32 %v3325_v41  ;;  %v829_v57 = vmul.f32 %v3322_v30, %v3247_v7  ;;  %v989_v23 = vmul.f32 %v3330_v46, %v4549_v60  ;;  %vm3404_vm2 = vmor %vm794_vm8, %vm795_vm11 }
 0x12e   :  { %1807 = vrsqrt.f32 %v3327_v28  ;;  %vm774_vm13 = vweird.f32 %v3104_v48  ;;  %vm785_vm14 = vweird.f32 %v3243_v33  ;;  %v3372_v44 = vmul.f32 0.5, %v820_v54 }
 0x12f   :  { %v747_v12 = vsel %vm3341_vm9, %v3098_v27, %v743_v1  ;;  %v757_v51 = vsel %vm756_vm12, %v3157_v50, %v753_v18  ;;  %v457_v55 = vmul.f32 0.0051020407, %v387_v49  ;;  %v810_v15 = vmul.f32 %v3312_v2, %v809_v9  ;;  %1070 = vrot.lane.b32.xlu0 %v989_v23, %s1887_s27  ;;  %v4550_v9 = vld [vmem:[#allocation6_spill] sm:$0xff]  ;;  %vm3454_vm7 = vmor %vm774_vm13, %vm775_vm10 }
 0x130   :  { %v3381_v60 = vmul.f32 %v3353_v59, %v747_v12  ;;  %v3384_v52 = vmul.f32 %v3358_v13, %v757_v51  ;;  %v458_v34 = vmul.f32 0.0051020407, %v391_v10  ;;  %v782_v54 = vsub.f32 1.5, %v3347_v40 }
 0x131   :  { %vm784_vm15 = vweird.f32 %v3159_v61  ;;  %v521_v27 = vsub.f32 %v457_v55, %v2852_v42  ;;  %v456_v1 = vmul.f32 0.0051020407, %v383_v4  ;;  %v793_v50 = vmul.f32 %v3193_v3, %v792_v63  ;;  %v3490_v61 = vld [vmem:[%s4431_s1 + $0xb8] sm:$0xff] }
 0x132   :  { %v3390_v18 = vpop.eup %1803  ;;  %vm825_vm1 = vweird.f32 %v3285_v21  ;;  %v987_v49 = vmul.f32 %v3381_v60, %v4550_v9  ;;  %v988_v51 = vmul.f32 %v3384_v52, %v4551_v62  ;;  %v522_v10 = vsub.f32 %v458_v34, %v2876_v11  ;;  %vm786_vm10 = vmor %vm784_vm15, %vm785_vm14 }
 0x133   :  { %v3398_v40 = vpop.eup %1805  ;;  %vm805_vm3 = vweird.f32 %v3226_v5  ;;  %vm824_vm4 = vweird.f32 %v3232_v29  ;;  %v830_v55 = vmul.f32 %v3322_v30, %v829_v57  ;;  %v849_v63 = vmul.f32 %v3390_v18, %v3318_v31 }
 0x134   :  { %v553_v11 = vmax.f32 %v521_v27, 0.0  ;;  %v520_v34 = vsub.f32 %v456_v1, %v2862_v32  ;;  %v3419_v23 = vpop.eup %1807  ;;  %v822_v4 = vsub.f32 1.5, %v3372_v44  ;;  %v811_v12 = vmul.f32 0.5, %v810_v15  ;;  %1066 = vrot.lane.b32.xlu2 %v987_v49, %s1887_s27  ;;  %1068 = vrot.lane.b32.xlu1 %v988_v51, %s1887_s27  ;;  %vm3496_vm13 = vmor %vm824_vm4, %vm825_vm1 }
 0x135   :  { %v554_v57 = vmax.f32 %v522_v10, 0.0  ;;  %v797_v27 = vsel %vm3404_vm2, %v3193_v3, %v793_v50  ;;  %vm804_vm5 = vweird.f32 %v3147_v47  ;;  %v850_v32 = vmul.f32 %v3390_v18, %v849_v63 }
 0x136   :  { %v839_v1 = vmul.f32 %v3419_v23, %v3327_v28  ;;  %v3431_v9 = vadd.f32 1e-05, %v553_v11  ;;  %v773_v15 = vmul.f32 %v3178_v36, %v772_v6  ;;  %vm814_vm6 = vweird.f32 %v3249_v56  ;;  %v3447_v6 = vld [vmem:[%s4431_s1 + $0x90] sm:$0xff]  ;;  %vm3528_vm1 = vmor %vm804_vm5, %vm805_vm3 }
 0x137   :  { %v859_v44 = vmul.f32 %v3398_v40, %v3325_v41  ;;  %v3437_v49 = vadd.f32 1e-05, %v554_v57  ;;  %v552_v62 = vmax.f32 %v520_v34, 0.0  ;;  %v3440_v3 = vmul.f32 %v3417_v19, %v797_v27  ;;  %v395_v34 = vpop.xlane.xlu0 %394 }
 0x138   :  { %v851_v50 = vmul.f32 0.5, %v850_v32  ;;  %v840_v51 = vmul.f32 %v3419_v23, %v839_v1  ;;  %1809 = vrsqrt.f32 %v3431_v9  ;;  %v783_v10 = vmul.f32 %v3243_v33, %v782_v54  ;;  %v4556_v54 = vld [vmem:[#allocation7_spill] sm:$0xff] }
 0x139   :  { %v812_v63 = vsub.f32 1.5, %v811_v12  ;;  %vm815_vm8 = vweird.f32 %v3312_v2  ;;  %1811 = vrsqrt.f32 %v3437_v49  ;;  %v3460_v11 = vadd.f32 1e-05, %v552_v62  ;;  %v3472_v12 = vld [vmem:[%s4431_s1 + $0x98] sm:$0xff] }
 0x13a   :  { %v831_v57 = vmul.f32 0.5, %v830_v55  ;;  %vm835_vm9 = vweird.f32 %v3322_v30  ;;  %vm854_vm11 = vweird.f32 %v3318_v31  ;;  %v992_v48 = vmul.f32 %v3440_v3, %v4556_v54  ;;  %vm3545_vm2 = vmor %vm814_vm6, %vm815_vm8 }
 0x13b   :  { %v777_v27 = vsel %vm3454_vm7, %v3178_v36, %v773_v15  ;;  %v852_v55 = vsub.f32 1.5, %v851_v50  ;;  %v860_v32 = vmul.f32 %v3398_v40, %v859_v44  ;;  %1813 = vrsqrt.f32 %v3460_v11  ;;  %v4559_v50 = vld [vmem:[#allocation10_spill] sm:$0xff] }
 0x13c   :  { %v3481_v1 = vmul.f32 %v3447_v6, %v777_v27  ;;  %vm834_vm12 = vweird.f32 %v3247_v7  ;;  %v841_v36 = vmul.f32 0.5, %v840_v51  ;;  %1076 = vrot.lane.b32.xlu0 %v992_v48, %s1887_s27  ;;  %v787_v15 = vsel %vm786_vm10, %v3243_v33, %v783_v10 }
 0x13d   :  { %v459_v62 = vmul.f32 0.0051020407, %v395_v34  ;;  %v823_v42 = vmul.f32 %v3285_v21, %v822_v4  ;;  %v3503_v33 = vmul.f32 %v3472_v12, %v787_v15  ;;  %v4560_v4 = vsub.f32 1.5, %v3316_v37  ;;  %v3520_v37 = vld [vmem:[%s4431_s1 + $0xa8] sm:$0xff]  ;;  %vm3604_vm6 = vmor %vm834_vm12, %vm835_vm9 }
 0x13e   :  { %v990_v51 = vmul.f32 %v3481_v1, %v4559_v50  ;;  %v813_v34 = vmul.f32 %v3312_v2, %v812_v63  ;;  %v3509_v54 = vpop.eup %1809  ;;  %v832_v48 = vsub.f32 1.5, %v831_v57  ;;  %vm855_vm14 = vweird.f32 %v3390_v18 }
 0x13f   :  { %v803_v10 = vmul.f32 %v3226_v5, %v4560_v4  ;;  %vm844_vm15 = vweird.f32 %v3327_v28  ;;  %v523_v29 = vsub.f32 %v459_v62, %v2872_v39  ;;  %v827_v27 = vsel %vm3496_vm13, %v3285_v21, %v823_v42  ;;  %v3522_v15 = vpop.eup %1811  ;;  %v4563_v21 = vld [vmem:[#allocation8_spill] sm:$0xff]  ;;  %vm3573_vm3 = vmor %vm854_vm11, %vm855_vm14 }
 0x140   :  { %v879_v39 = vmul.f32 %v3509_v54, %v3431_v9  ;;  %1072 = vrot.lane.b32.xlu2 %v990_v51, %s1887_s27  ;;  %v991_v57 = vmul.f32 %v3503_v33, %v4563_v21  ;;  %v3538_v62 = vmul.f32 %v3490_v61, %v827_v27  ;;  %v853_v42 = vmul.f32 %v3390_v18, %v852_v55  ;;  %v3555_v27 = vld [vmem:[%s4431_s1 + $0xb0] sm:$0xff]  ;;  %v4566_v21 = vld [vmem:[#allocation11_spill] sm:$0xff] }
 0x141   :  { %v861_v44 = vmul.f32 0.5, %v860_v32  ;;  %v842_v50 = vsub.f32 1.5, %v841_v36  ;;  %v555_v4 = vmax.f32 %v523_v29, 0.0  ;;  %v807_v51 = vsel %vm3528_vm1, %v3226_v5, %v803_v10  ;;  %v3557_v55 = vpop.eup %1813 }
 0x142   :  { %v880_v56 = vmul.f32 %v3509_v54, %v879_v39  ;;  %1074 = vrot.lane.b32.xlu1 %v991_v57, %s1887_s27  ;;  %v995_v32 = vmul.f32 %v3538_v62, %v4566_v21  ;;  %v3564_v36 = vmul.f32 %v3520_v37, %v807_v51  ;;  %v817_v5 = vsel %vm3545_vm2, %v3312_v2, %v813_v34  ;;  %v3586_v2 = vld [vmem:[%s4431_s1 + $0xd0] sm:$0xff]  ;;  %v4571_v21 = vld [vmem:[#allocation13_spill] sm:$0xff] }
 0x143   :  { %v889_v29 = vmul.f32 %v3522_v15, %v3437_v49  ;;  %v869_v63 = vmul.f32 %v3557_v55, %v3460_v11  ;;  %v3581_v39 = vadd.f32 1e-05, %v555_v4  ;;  %v833_v34 = vmul.f32 %v3322_v30, %v832_v48 }
 0x144   :  { %vm845_vm4 = vweird.f32 %v3419_v23  ;;  %v881_v31 = vmul.f32 0.5, %v880_v56  ;;  %v3591_v57 = vmul.f32 %v3555_v27, %v817_v5  ;;  %v857_v47 = vsel %vm3573_vm3, %v3390_v18, %v853_v42  ;;  %1082 = vrot.lane.b32.xlu0 %v995_v32, %s1887_s27  ;;  %v4572_v42 = vld [vmem:[#allocation12_spill] sm:$0xff] }
 0x145   :  { %v862_v51 = vsub.f32 1.5, %v861_v44  ;;  %vm885_vm5 = vweird.f32 %v3509_v54  ;;  %v870_v4 = vmul.f32 %v3557_v55, %v869_v63  ;;  %1815 = vrsqrt.f32 %v3581_v39  ;;  %v3622_v63 = vld [vmem:[%s4431_s1 + $0xc0] sm:$0xff]  ;;  %vm846_vm7 = vmor %vm844_vm15, %vm845_vm4 }
 0x146   :  { %v882_v56 = vsub.f32 1.5, %v881_v31  ;;  %v993_v18 = vmul.f32 %v3564_v36, %v4571_v21  ;;  %v994_v44 = vmul.f32 %v3591_v57, %v4572_v42  ;;  %v3613_v5 = vmul.f32 %v3586_v2, %v857_v47  ;;  %v3628_v21 = vld [vmem:[%s4431_s1 + $0xc8] sm:$0xff] }
 0x147   :  { %v890_v32 = vmul.f32 %v3522_v15, %v889_v29  ;;  %v871_v10 = vmul.f32 0.5, %v870_v4  ;;  %v837_v7 = vsel %vm3604_vm6, %v3322_v30, %v833_v34  ;;  %v843_v31 = vmul.f32 %v3419_v23, %v842_v50  ;;  %v4575_v34 = vld [vmem:[#allocation14_spill] sm:$0xff]  ;;  %v4581_v50 = vld [vmem:[#allocation15_spill] sm:$0xff] }
 0x148   :  { %vm884_vm8 = vweird.f32 %v3431_v9  ;;  %1078 = vrot.lane.b32.xlu2 %v993_v18, %s1887_s27  ;;  %v883_v30 = vmul.f32 %v3509_v54, %v882_v56  ;;  %v998_v47 = vmul.f32 %v3613_v5, %v4575_v34  ;;  %v1888_v28 = vmov 0  }
 0x149   :  { %vm3639_vm9 = vmor %vm884_vm8, %vm885_vm5  ;;  %v872_v29 = vsub.f32 1.5, %v871_v10  ;;  %v847_v4 = vsel %vm846_vm7, %v3419_v23, %v843_v31  ;;  %1747 = vset.pattern.permute.xlu0 %v1888_v28  ;;  %1749 = vset.pattern.permute.xlu1 %v1888_v28  ;;  %vm865_vm11 = vweird.f32 %v3398_v40  ;;  %v3649_v9 = vmul.f32 %v3622_v63, %v837_v7  ;;  %v3660_v23 = vld [vmem:[%s4431_s1 + $0xe8] sm:$0xff] }
 0x14a   :  { %1080 = vrot.lane.b32.xlu1 %v994_v44, %s1887_s27  ;;  %v3652_v48 = vmul.f32 %v3628_v21, %v847_v4  ;;  %v887_v56 = vsel %vm3639_vm9, %v3509_v54, %v883_v30  ;;  %1748 = vset.pattern.permute.xlu2 %v1888_v28  ;;  %v891_v42 = vmul.f32 0.5, %v890_v32  ;;  %vm875_vm10 = vweird.f32 %v3557_v55  ;;  %v4580_v30 = vld [vmem:[#allocation16_spill] sm:$0xff]  ;;  %v3698_v28 = vld [vmem:[%s4431_s1 + $0xe0] sm:$0xff] }
 0x14b   :  { %v1816_v18 = vpop.eup %1815  ;;  %v863_v44 = vmul.f32 %v3398_v40, %v862_v51  ;;  %v873_v10 = vmul.f32 %v3557_v55, %v872_v29  ;;  %vm864_vm12 = vweird.f32 %v3325_v41  ;;  %vm874_vm14 = vweird.f32 %v3460_v11 }
 0x14c   :  { %v899_v7 = vmul.f32 %v1816_v18, %v3581_v39  ;;  %vm3667_vm13 = vmor %vm864_vm12, %vm865_vm11  ;;  %1088 = vrot.lane.b32.xlu0 %v998_v47, %s1887_s27  ;;  %v3674_v32 = vmul.f32 %v3660_v23, %v887_v56  ;;  %v996_v41 = vmul.f32 %v3649_v9, %v4580_v30  ;;  %v997_v29 = vmul.f32 %v3652_v48, %v4581_v50  ;;  %v3690_v47 = vld [vmem:[%s4431_s1 + $0xd8] sm:$0xff] }
 0x14d   :  { %vm3676_vm15 = vmor %vm874_vm14, %vm875_vm10  ;;  %v892_v34 = vsub.f32 1.5, %v891_v42  ;;  %v867_v11 = vsel %vm3667_vm13, %v3398_v40, %v863_v44  ;;  %vm895_vm1 = vweird.f32 %v3522_v15  ;;  %vm905_vm2 = vweird.f32 %v1816_v18  ;;  %v4583_v30 = vld [vmem:[#allocation21_spill] sm:$0xff] }
 0x14e   :  { %v900_v51 = vmul.f32 %v1816_v18, %v899_v7  ;;  %v877_v4 = vsel %vm3676_vm15, %v3557_v55, %v873_v10  ;;  %v1001_v40 = vmul.f32 %v3674_v32, %v2779_v45  ;;  %v3706_v44 = vmul.f32 %v3690_v47, %v867_v11  ;;  %v4586_v11 = vld [vmem:[#allocation23_spill] sm:$0xff] }
 0x14f   :  { %v3709_v55 = vmul.f32 %v3698_v28, %v877_v4  ;;  %v893_v10 = vmul.f32 %v3522_v15, %v892_v34  ;;  %vm894_vm3 = vweird.f32 %v3437_v49  ;;  %vm904_vm5 = vweird.f32 %v3581_v39  ;;  %v3728_v39 = vld [vmem:[%s4431_s1 + $0xf8] sm:$0xff]  ;;  %v4585_v34 = vld [vmem:[#allocation24_spill] sm:$0xff] }
 0x150   :  { %v901_v56 = vmul.f32 0.5, %v900_v51  ;;  %1084 = vrot.lane.b32.xlu2 %v996_v41, %s1887_s27  ;;  %vm896_vm4 = vmor %vm894_vm3, %vm895_vm1  ;;  %v999_v45 = vmul.f32 %v3706_v44, %v2789_v53  ;;  %v3723_v51 = vld [vmem:[%s4431_s1 + $0xf0] sm:$0xff] }
 0x151   :  { %vm906_vm6 = vmor %vm904_vm5, %vm905_vm2  ;;  %v1000_v54 = vmul.f32 %v3709_v55, %v2782_v17  ;;  %v897_v31 = vsel %vm896_vm4, %v3522_v15, %v893_v10  ;;  %v4582_v15 = vld [vmem:[#allocation19_spill] sm:$0xff]  ;;  %v4584_v41 = vld [vmem:[#allocation20_spill] sm:$0xff] }
 0x152   :  { %v902_v42 = vsub.f32 1.5, %v901_v56  ;;  %1086 = vrot.lane.b32.xlu1 %v997_v29, %s1887_s27  ;;  %v3733_v53 = vmul.f32 %v3723_v51, %v897_v31  ;;  %v3743_v29 = vpop.permute.xlu2 %1038  ;;  %v4587_v56 = vld [vmem:[#allocation22_spill] sm:$0xff] }
 0x154   :  { %v903_v7 = vmul.f32 %v1816_v18, %v902_v42  ;;  %1094 = vrot.lane.b32.xlu0 %v1001_v40, %s1887_s27  ;;  %v4588_v40 = vld [vmem:[#allocation25_spill] sm:$0xff] }
 0x156   :  { %v907_v49 = vsel %vm906_vm6, %v1816_v18, %v903_v7  ;;  %v1002_v18 = vmul.f32 %v3733_v53, %v4583_v30 }
 0x157   :  { %v3736_v17 = vmul.f32 %v3728_v39, %v907_v49  ;;  %v1819_v49 = vld [vmem:[%s4431_s1 + $0x8] sm:$0xff] }
 0x158   :  { %1090 = vrot.lane.b32.xlu2 %v999_v45, %s1887_s27 }
 0x159   :  { %v1003_v50 = vmul.f32 %v3736_v17, %v4584_v41 }
 0x15a   :  { %1092 = vrot.lane.b32.xlu1 %v1000_v54, %s1887_s27 }
 0x15c   :  { %1166 = vperm.xlu0 %1747, %v4582_v15   ;;  %v3749_v4 = vpop.permute.xlu2 %1042  ;;  %v1037_v7 = vpop.permute.xlu1 %1036  ;;  %v1133_v15 = vsub.f32 %v1819_v49, %v3743_v29 }
 0x160   :  { %1096 = vrot.lane.b32.xlu2 %v1002_v18, %s1887_s27 }
 0x162   :  { %1098 = vrot.lane.b32.xlu1 %v1003_v50, %s1887_s27  ;;  %v1821_v50 = vld [vmem:[%s4431_s1 + $0x18] sm:$0xff] }
 0x163   :  { %v1135_v29 = vsub.f32 %v1821_v50, %v3749_v4 }
 0x164   :  { %1191 = vperm.xlu0 %1747, %v4585_v34  }
 0x168   :  { %1171 = vperm.xlu2 %1748, %v4586_v11   ;;  %v3757_v10 = vpop.permute.xlu0 %1040  ;;  %v1822_v11 = vld [vmem:[%s4431_s1 + $0x20] sm:$0xff] }
 0x169   :  { %v3755_v42 = vpop.permute.xlu2 %1048 }
 0x16a   :  { %1176 = vperm.xlu1 %1749, %v4587_v56  }
 0x16c   :  { %1206 = vperm.xlu0 %1747, %v3048_v58  }
 0x170   :  { %1181 = vperm.xlu2 %1748, %v4588_v40  }
 0x172   :  { %1186 = vperm.xlu1 %1749, %v2976_v26   ;;  %v3762_v45 = vpop.permute.xlu2 %1054  ;;  %v1047_v58 = vpop.permute.xlu0 %1046 }
 0x174   :  { %1221 = vperm.xlu0 %1747, %v3125_v8  }
 0x178   :  { %1196 = vperm.xlu2 %1748, %v3058_v0   ;;  %v3767_v26 = vpop.permute.xlu1 %1044 }
 0x179   :  { %v1136_v56 = vsub.f32 %v1822_v11, %v3767_v26  ;;  %v4591_v26 = vld [vmem:[#allocation2_spill] sm:$0xff] }
 0x17a   :  { %1201 = vperm.xlu1 %1749, %v3074_v25  }
 0x17c   :  { %1236 = vperm.xlu0 %1747, %v3235_v43  }
 0x17f   :  { %v3770_v54 = vpop.permute.xlu2 %1060 }
 0x180   :  { %1211 = vperm.xlu2 %1748, %v3131_v14   ;;  %v1053_v8 = vpop.permute.xlu0 %1052 }
 0x182   :  { %1216 = vperm.xlu1 %1749, %v3173_v24  }
 0x183   :  { %v3774_v0 = vpop.permute.xlu1 %1050 }
 0x184   :  { %1251 = vperm.xlu0 %1747, %v3330_v46  }
 0x188   :  { %1226 = vperm.xlu2 %1748, %v3240_v38  }
 0x18a   :  { %1231 = vperm.xlu1 %1749, %v3279_v16   ;;  %v1059_v14 = vpop.permute.xlu0 %1058 }
 0x18b   :  { %v1143_v18 = vsub.f32 %v3095_v22, %v1059_v14 }
 0x18c   :  { %1266 = vperm.xlu0 %1747, %v3440_v3  }
 0x18e   :  { %v3778_v25 = vpop.permute.xlu2 %1066  ;;  %v3782_v24 = vpop.permute.xlu1 %1056 }
 0x190   :  { %1241 = vperm.xlu2 %1748, %v3381_v60  }
 0x192   :  { %1246 = vperm.xlu1 %1749, %v3384_v52  }
 0x194   :  { %1281 = vperm.xlu0 %1747, %v3538_v62   ;;  %v1889_v62 = vmov 1  }
 0x196   :  { %v1065_v38 = vpop.permute.xlu0 %1064 }
 0x197   :  { %v1146_v22 = vsub.f32 %v3209_v20, %v1065_v38  ;;  %v4592_v20 = vld [vmem:[#allocation28_spill] sm:$0xff] }
 0x198   :  { %1256 = vperm.xlu2 %1748, %v3481_v1   ;;  %v1817_v1 = vld [vmem:[%s4431_s1] sm:$0xff]  ;;  %v1141_v38 = vsub.f32 %v4592_v20, %v3762_v45  ;;  %v4595_v45 = vld [vmem:[#allocation31_spill] sm:$0xff] }
 0x19a   :  { %1261 = vperm.xlu1 %1749, %v3503_v33   ;;  %v3786_v43 = vpop.permute.xlu2 %1072  ;;  %v3790_v16 = vpop.permute.xlu1 %1062  ;;  %v1132_v33 = vsub.f32 %v1817_v1, %v1037_v7  ;;  %v4589_v7 = vld [vmem:[#allocation26_spill] sm:$0xff] }
 0x19c   :  { %1296 = vperm.xlu0 %1747, %v3613_v5   ;;  %v1818_v5 = vld [vmem:[%s4431_s1 + $0x28] sm:$0xff] }
 0x1a0   :  { %1271 = vperm.xlu2 %1748, %v3564_v36  }
 0x1a1   :  { %v1071_v46 = vpop.permute.xlu0 %1070 }
 0x1a2   :  { %1276 = vperm.xlu1 %1749, %v3591_v57   ;;  %v3793_v52 = vpop.permute.xlu2 %1078 }
 0x1a4   :  { %1311 = vperm.xlu0 %1747, %v3674_v32  }
 0x1a6   :  { %v3800_v3 = vpop.permute.xlu1 %1068 }
 0x1a8   :  { %1286 = vperm.xlu2 %1748, %v3649_v9   ;;  %v1137_v9 = vsub.f32 %v1818_v5, %v1047_v58  ;;  %v1138_v58 = vsub.f32 %v4589_v7, %v3755_v42  ;;  %v4593_v42 = vld [vmem:[#allocation29_spill] sm:$0xff] }
 0x1aa   :  { %1291 = vperm.xlu1 %1749, %v3652_v48   ;;  %v3798_v60 = vpop.permute.xlu2 %1084 }
 0x1ac   :  { %1750 = vset.pattern.permute.xlu0 %v1889_v62 }
 0x1ad   :  { %1390 = vperm.xlu0 %1750, %v1132_v33   ;;  %v1149_v33 = vsub.f32 %v4591_v26, %v1071_v46  ;;  %v4594_v46 = vld [vmem:[#allocation30_spill] sm:$0xff] }
 0x1ae   :  { %v1077_v36 = vpop.permute.xlu0 %1076 }
 0x1b0   :  { %1301 = vperm.xlu2 %1748, %v3706_v44   ;;  %v1140_v44 = vsub.f32 %v3019_v35, %v1053_v8  ;;  %v4590_v8 = vld [vmem:[#allocation27_spill] sm:$0xff] }
 0x1b1   :  { %v1139_v14 = vsub.f32 %v4590_v8, %v3774_v0  ;;  %v1152_v0 = vsub.f32 %v3417_v19, %v1077_v36  ;;  %v1147_v19 = vsub.f32 %v3353_v59, %v3778_v25 }
 0x1b2   :  { %1306 = vperm.xlu1 %1749, %v3709_v55   ;;  %v3807_v57 = vpop.permute.xlu2 %1090 }
 0x1b4   :  { %v3812_v48 = vpop.permute.xlu1 %1074 }
 0x1b5   :  { %1415 = vperm.xlu0 %1750, %v1137_v9   ;;  %v1142_v9 = vsub.f32 %v4593_v42, %v3782_v24  ;;  %v1151_v59 = vsub.f32 %v3472_v12, %v3812_v48 }
 0x1b6   :  { %v1083_v32 = vpop.permute.xlu0 %1082 }
 0x1b7   :  { %v1155_v24 = vsub.f32 %v3490_v61, %v1083_v32  ;;  %v1150_v61 = vsub.f32 %v3447_v6, %v3786_v43 }
 0x1b8   :  { %1316 = vperm.xlu2 %1748, %v3733_v53   ;;  %v1820_v53 = vld [vmem:[%s4431_s1 + $0x10] sm:$0xff] }
 0x1ba   :  { %1321 = vperm.xlu1 %1749, %v3736_v17   ;;  %v3816_v31 = vpop.permute.xlu2 %1096  ;;  %v1134_v17 = vsub.f32 %v1820_v53, %v3757_v10 }
 0x1bc   :  { %v3819_v55 = vpop.permute.xlu1 %1080 }
 0x1bd   :  { %1430 = vperm.xlu0 %1750, %v1140_v44   ;;  %v1154_v6 = vsub.f32 %v3555_v27, %v3819_v55  ;;  %v1159_v27 = vsub.f32 %v3690_v47, %v3807_v57 }
 0x1be   :  { %v1089_v30 = vpop.permute.xlu0 %1088 }
 0x1c0   :  { %1751 = vset.pattern.permute.xlu2 %v1889_v62 }
 0x1c1   :  { %1395 = vperm.xlu2 %1751, %v1133_v15   ;;  %v1144_v15 = vsub.f32 %v4594_v46, %v3770_v54  ;;  %v1148_v54 = vsub.f32 %v3358_v13, %v3800_v3  ;;  %v1827_v46 = vld [vmem:[%s4430_s0 + $0x30] sm:$0xff] }
 0x1c2   :  { %1752 = vset.pattern.permute.xlu1 %v1889_v62  ;;  %v3829_v35 = vpop.permute.xlu2 %1171 }
 0x1c3   :  { %1400 = vperm.xlu1 %1752, %v1134_v17   ;;  %v1145_v17 = vsub.f32 %v4595_v45, %v3790_v16  ;;  %v1158_v16 = vsub.f32 %v3586_v2, %v1089_v30  ;;  %v1153_v2 = vsub.f32 %v3520_v37, %v3793_v52 }
 0x1c4   :  { %v3832_v41 = vpop.permute.xlu1 %1086 }
 0x1c5   :  { %1445 = vperm.xlu0 %1750, %v1143_v18  }
 0x1c6   :  { %v1095_v34 = vpop.permute.xlu0 %1094 }
 0x1c7   :  { %v1161_v13 = vsub.f32 %v3660_v23, %v1095_v34  ;;  %v1156_v23 = vsub.f32 %v3622_v63, %v3798_v60  ;;  %v1157_v34 = vsub.f32 %v3628_v21, %v3832_v41  ;;  %v1162_v21 = vsub.f32 %v3723_v51, %v3816_v31  ;;  %v1824_v51 = vld [vmem:[%s4430_s0 + $0x18] sm:$0xff] }
 0x1c9   :  { %1405 = vperm.xlu2 %1751, %v1135_v29  }
 0x1ca   :  { %v3842_v40 = vpop.permute.xlu2 %1181 }
 0x1cb   :  { %1410 = vperm.xlu1 %1752, %v1136_v56  }
 0x1cc   :  { %v3845_v10 = vpop.permute.xlu1 %1092 }
 0x1cd   :  { %1460 = vperm.xlu0 %1750, %v1146_v22   ;;  %v1160_v56 = vsub.f32 %v3698_v28, %v3845_v10  ;;  %v1823_v10 = vld [vmem:[%s4430_s0 + $0x10] sm:$0xff] }
 0x1ce   :  { %v3849_v4 = vpop.permute.xlu0 %1166  ;;  %v1326_v7 = vmul.f32 %v1823_v10, %v3829_v35 }
 0x1d1   :  { %1420 = vperm.xlu2 %1751, %v1138_v58  }
 0x1d2   :  { %v3853_v1 = vpop.permute.xlu2 %1196 }
 0x1d3   :  { %1425 = vperm.xlu1 %1752, %v1139_v14  }
 0x1d4   :  { %v3856_v62 = vpop.permute.xlu1 %1098 }
 0x1d5   :  { %1475 = vperm.xlu0 %1750, %v1149_v33   ;;  %v1163_v22 = vsub.f32 %v3728_v39, %v3856_v62  ;;  %v1327_v39 = vmul.f32 %v1824_v51, %v3829_v35  ;;  %v1825_v62 = vld [vmem:[%s4430_s0] sm:$0xff] }
 0x1d6   :  { %v3860_v5 = vpop.permute.xlu0 %1191  ;;  %v1324_v20 = vmul.f32 %v1825_v62, %v3849_v4 }
 0x1d9   :  { %1435 = vperm.xlu2 %1751, %v1141_v38   ;;  %v1826_v38 = vld [vmem:[%s4430_s0 + $0x8] sm:$0xff] }
 0x1da   :  { %v3864_v44 = vpop.permute.xlu2 %1211  ;;  %v1325_v42 = vmul.f32 %v1826_v38, %v3849_v4  ;;  %v1828_v4 = vld [vmem:[%s4430_s0 + $0x38] sm:$0xff] }
 0x1db   :  { %1440 = vperm.xlu1 %1752, %v1142_v9   ;;  %v1331_v45 = vmul.f32 %v1828_v4, %v3842_v40 }
 0x1dc   :  { %v3867_v49 = vpop.permute.xlu1 %1176 }
 0x1dd   :  { %1490 = vperm.xlu0 %1750, %v1152_v0  }
 0x1de   :  { %v3871_v53 = vpop.permute.xlu0 %1206 }
 0x1e1   :  { %1450 = vperm.xlu2 %1751, %v1144_v15   ;;  %v1330_v15 = vmul.f32 %v1827_v46, %v3842_v40  ;;  %v1829_v40 = vld [vmem:[%s4430_s0 + $0x50] sm:$0xff] }
 0x1e2   :  { %v3875_v18 = vpop.permute.xlu2 %1226 }
 0x1e3   :  { %1455 = vperm.xlu1 %1752, %v1145_v17  }
 0x1e4   :  { %v3878_v50 = vpop.permute.xlu1 %1186 }
 0x1e5   :  { %1505 = vperm.xlu0 %1750, %v1155_v24  }
 0x1e6   :  { %v3882_v36 = vpop.permute.xlu0 %1221 }
 0x1e9   :  { %1465 = vperm.xlu2 %1751, %v1147_v19  }
 0x1ea   :  { %v3886_v29 = vpop.permute.xlu2 %1241 }
 0x1eb   :  { %1470 = vperm.xlu1 %1752, %v1148_v54  }
 0x1ec   :  { %v3889_v11 = vpop.permute.xlu1 %1201 }
 0x1ed   :  { %1520 = vperm.xlu0 %1750, %v1158_v16  }
 0x1ee   :  { %v3893_v32 = vpop.permute.xlu0 %1236 }
 0x1f1   :  { %1480 = vperm.xlu2 %1751, %v1150_v61  }
 0x1f2   :  { %v3897_v25 = vpop.permute.xlu2 %1256 }
 0x1f3   :  { %1485 = vperm.xlu1 %1752, %v1151_v59  }
 0x1f4   :  { %v3900_v3 = vpop.permute.xlu1 %1216 }
 0x1f5   :  { %1535 = vperm.xlu0 %1750, %v1161_v13  }
 0x1f6   :  { %v3904_v30 = vpop.permute.xlu0 %1251 }
 0x1f9   :  { %1495 = vperm.xlu2 %1751, %v1153_v2   ;;  %v1334_v2 = vmul.f32 %v1829_v40, %v3860_v5 }
 0x1fa   :  { %v3908_v43 = vpop.permute.xlu2 %1271 }
 0x1fb   :  { %1500 = vperm.xlu1 %1752, %v1154_v6   ;;  %v1830_v6 = vld [vmem:[%s4430_s0 + $0x58] sm:$0xff] }
 0x1fc   :  { %v3910_v12 = vpop.permute.xlu1 %1231 }
 0x1fe   :  { %v3914_v48 = vpop.permute.xlu0 %1266 }
 0x201   :  { %1510 = vperm.xlu2 %1751, %v1156_v23   ;;  %v1335_v23 = vmul.f32 %v1830_v6, %v3860_v5  ;;  %v1832_v5 = vld [vmem:[%s4430_s0 + $0x68] sm:$0xff] }
 0x202   :  { %v3918_v37 = vpop.permute.xlu2 %1286  ;;  %v1337_v10 = vmul.f32 %v1832_v5, %v3853_v1 }
 0x203   :  { %1515 = vperm.xlu1 %1752, %v1157_v34  }
 0x204   :  { %v3920_v52 = vpop.permute.xlu1 %1246 }
 0x206   :  { %v3924_v55 = vpop.permute.xlu0 %1281 }
 0x209   :  { %1525 = vperm.xlu2 %1751, %v1159_v27  }
 0x20a   :  { %v3928_v63 = vpop.permute.xlu2 %1301 }
 0x20b   :  { %1530 = vperm.xlu1 %1752, %v1160_v56  }
 0x20c   :  { %v3930_v60 = vpop.permute.xlu1 %1261 }
 0x20e   :  { %v3934_v41 = vpop.permute.xlu0 %1296 }
 0x211   :  { %1540 = vperm.xlu2 %1751, %v1162_v21   ;;  %v1831_v21 = vld [vmem:[%s4430_s0 + $0x60] sm:$0xff] }
 0x212   :  { %v3938_v47 = vpop.permute.xlu2 %1316 }
 0x213   :  { %1545 = vperm.xlu1 %1752, %v1163_v22   ;;  %v1336_v22 = vmul.f32 %v1831_v21, %v3853_v1  ;;  %v1833_v1 = vld [vmem:[%s4430_s0 + $0x80] sm:$0xff] }
 0x214   :  { %v3940_v57 = vpop.permute.xlu1 %1276  ;;  %v1340_v62 = vmul.f32 %v1833_v1, %v3871_v53  ;;  %v1843_v1 = vld [vmem:[%s4430_s0 + $0x40] sm:$0xff] }
 0x216   :  { %v3942_v28 = vpop.permute.xlu0 %1311 }
 0x21b   :  { %v1396_v31 = vpop.permute.xlu2 %1395 }
 0x21c   :  { %v3952_v58 = vpop.permute.xlu1 %1291  ;;  %v1550_v8 = vadd.f32 %v1396_v31, %v1326_v7  ;;  %v1551_v14 = vadd.f32 %v1396_v31, %v1327_v39 }
 0x21e   :  { %v1614_v26 = vmax.f32 %v1550_v8, 0.0  ;;  %v1615_v33 = vmax.f32 %v1551_v14, 0.0 }
 0x21f   :  { %v1391_v35 = vpop.permute.xlu0 %1390 }
 0x220   :  { %1678 = vst [vmem:[%s4432_s2 + $0x10] sm:$0xff] %v1614_v26  ;;  %v1548_v9 = vadd.f32 %v1391_v35, %v1324_v20  ;;  %v1549_v0 = vadd.f32 %v1391_v35, %v1325_v42  ;;  %v1834_v20 = vld [vmem:[%s4430_s0 + $0x88] sm:$0xff] }
 0x221   :  { %1679 = vst.msk [vmem:[%s4432_s2 + $0x18] sm:$0xff] %vm75_vm0, %v1615_v33  ;;  %v1341_v38 = vmul.f32 %v1834_v20, %v3871_v53  ;;  %v1836_v53 = vld [vmem:[%s4430_s0 + $0x98] sm:$0xff] }
 0x222   :  { %v1612_v24 = vmax.f32 %v1548_v9, 0.0  ;;  %v1613_v19 = vmax.f32 %v1549_v0, 0.0  ;;  %v1835_v0 = vld [vmem:[%s4430_s0 + $0x90] sm:$0xff] }
 0x223   :  { %v1406_v17 = vpop.permute.xlu2 %1405  ;;  %v1342_v46 = vmul.f32 %v1835_v0, %v3864_v44 }
 0x224   :  { %v3977_v54 = vpop.permute.xlu1 %1306  ;;  %v1554_v16 = vadd.f32 %v1406_v17, %v1330_v15  ;;  %v1555_v61 = vadd.f32 %v1406_v17, %v1331_v45  ;;  %1676 = vst [vmem:[%s4432_s2] sm:$0xff] %v1612_v24  ;;  %v1343_v15 = vmul.f32 %v1836_v53, %v3864_v44  ;;  %v1837_v24 = vld [vmem:[%s4430_s0 + $0x20] sm:$0xff] }
 0x225   :  { %1677 = vst.msk [vmem:[%s4432_s2 + $0x8] sm:$0xff] %vm75_vm0, %v1613_v19  ;;  %v1328_v19 = vmul.f32 %v1837_v24, %v3867_v49 }
 0x226   :  { %v1618_v59 = vmax.f32 %v1554_v16, 0.0  ;;  %v1619_v13 = vmax.f32 %v1555_v61, 0.0  ;;  %v1838_v16 = vld [vmem:[%s4430_s0 + $0x28] sm:$0xff] }
 0x227   :  { %v1416_v34 = vpop.permute.xlu0 %1415  ;;  %v1329_v61 = vmul.f32 %v1838_v16, %v3867_v49  ;;  %v1839_v49 = vld [vmem:[%s4430_s0 + $0xb0] sm:$0xff] }
 0x228   :  { %1682 = vst [vmem:[%s4432_s2 + $0x30] sm:$0xff] %v1618_v59  ;;  %v1558_v27 = vadd.f32 %v1416_v34, %v1334_v2  ;;  %v1559_v56 = vadd.f32 %v1416_v34, %v1335_v23  ;;  %v1346_v34 = vmul.f32 %v1839_v49, %v3882_v36 }
 0x229   :  { %1683 = vst.msk [vmem:[%s4432_s2 + $0x38] sm:$0xff] %vm75_vm0, %v1619_v13 }
 0x22a   :  { %v1622_v51 = vmax.f32 %v1558_v27, 0.0  ;;  %v1623_v39 = vmax.f32 %v1559_v56, 0.0  ;;  %v1840_v27 = vld [vmem:[%s4430_s0 + $0xb8] sm:$0xff] }
 0x22b   :  { %v1421_v7 = vpop.permute.xlu2 %1420  ;;  %v1347_v56 = vmul.f32 %v1840_v27, %v3882_v36 }
 0x22c   :  { %v4009_v31 = vpop.permute.xlu1 %1321  ;;  %v1560_v8 = vadd.f32 %v1421_v7, %v1336_v22  ;;  %v1561_v14 = vadd.f32 %v1421_v7, %v1337_v10  ;;  %1686 = vst [vmem:[%s4432_s2 + $0x50] sm:$0xff] %v1622_v51  ;;  %v1841_v51 = vld [vmem:[%s4430_s0 + $0xc0] sm:$0xff] }
 0x22d   :  { %1687 = vst.msk [vmem:[%s4432_s2 + $0x58] sm:$0xff] %vm75_vm0, %v1623_v39  ;;  %v1348_v36 = vmul.f32 %v1841_v51, %v3875_v18  ;;  %v1842_v39 = vld [vmem:[%s4430_s0 + $0xc8] sm:$0xff] }
 0x22e   :  { %v1624_v26 = vmax.f32 %v1560_v8, 0.0  ;;  %v1625_v33 = vmax.f32 %v1561_v14, 0.0  ;;  %v1349_v8 = vmul.f32 %v1842_v39, %v3875_v18  ;;  %v1844_v18 = vld [vmem:[%s4430_s0 + $0x48] sm:$0xff] }
 0x22f   :  { %v1431_v42 = vpop.permute.xlu0 %1430  ;;  %v1333_v20 = vmul.f32 %v1844_v18, %v3878_v50  ;;  %v1854_v18 = vld [vmem:[%s4430_s0 + $0x128] sm:$0xff] }
 0x230   :  { %1688 = vst [vmem:[%s4432_s2 + $0x60] sm:$0xff] %v1624_v26  ;;  %v1564_v35 = vadd.f32 %v1431_v42, %v1340_v62  ;;  %v1565_v9 = vadd.f32 %v1431_v42, %v1341_v38  ;;  %v1332_v62 = vmul.f32 %v1843_v1, %v3878_v50  ;;  %v1845_v50 = vld [vmem:[%s4430_s0 + $0xe0] sm:$0xff] }
 0x231   :  { %1689 = vst.msk [vmem:[%s4432_s2 + $0x68] sm:$0xff] %vm75_vm0, %v1625_v33 }
 0x232   :  { %v1628_v45 = vmax.f32 %v1564_v35, 0.0  ;;  %v1629_v17 = vmax.f32 %v1565_v9, 0.0 }
 0x233   :  { %v1436_v4 = vpop.permute.xlu2 %1435 }
 0x234   :  { %v1566_v59 = vadd.f32 %v1436_v4, %v1342_v46  ;;  %v1567_v13 = vadd.f32 %v1436_v4, %v1343_v15  ;;  %1692 = vst [vmem:[%s4432_s2 + $0x80] sm:$0xff] %v1628_v45  ;;  %v1352_v15 = vmul.f32 %v1845_v50, %v3893_v32  ;;  %v1846_v4 = vld [vmem:[%s4430_s0 + $0xe8] sm:$0xff] }
 0x235   :  { %v1401_v40 = vpop.permute.xlu1 %1400  ;;  %1693 = vst.msk [vmem:[%s4432_s2 + $0x88] sm:$0xff] %vm75_vm0, %v1629_v17  ;;  %v1353_v45 = vmul.f32 %v1846_v4, %v3893_v32 }
 0x236   :  { %v1630_v44 = vmax.f32 %v1566_v59, 0.0  ;;  %v1631_v2 = vmax.f32 %v1567_v13, 0.0  ;;  %v1552_v6 = vadd.f32 %v1401_v40, %v1328_v19  ;;  %v1553_v23 = vadd.f32 %v1401_v40, %v1329_v61  ;;  %v1847_v59 = vld [vmem:[%s4430_s0 + $0xf0] sm:$0xff]  ;;  %v1848_v13 = vld [vmem:[%s4430_s0 + $0xf8] sm:$0xff] }
 0x237   :  { %v1446_v5 = vpop.permute.xlu0 %1445  ;;  %v1354_v32 = vmul.f32 %v1847_v59, %v3886_v29  ;;  %v1355_v40 = vmul.f32 %v1848_v13, %v3886_v29  ;;  %v1850_v29 = vld [vmem:[%s4430_s0 + $0x78] sm:$0xff] }
 0x238   :  { %1694 = vst [vmem:[%s4432_s2 + $0x90] sm:$0xff] %v1630_v44  ;;  %v1616_v21 = vmax.f32 %v1552_v6, 0.0  ;;  %v1617_v22 = vmax.f32 %v1553_v23, 0.0  ;;  %v1570_v10 = vadd.f32 %v1446_v5, %v1346_v34  ;;  %v1571_v7 = vadd.f32 %v1446_v5, %v1347_v56  ;;  %v1849_v23 = vld [vmem:[%s4430_s0 + $0x70] sm:$0xff] }
 0x239   :  { %1695 = vst.msk [vmem:[%s4432_s2 + $0x98] sm:$0xff] %vm75_vm0, %v1631_v2  ;;  %v1338_v49 = vmul.f32 %v1849_v23, %v3889_v11  ;;  %v1339_v34 = vmul.f32 %v1850_v29, %v3889_v11  ;;  %v1851_v11 = vld [vmem:[%s4430_s0 + $0x110] sm:$0xff] }
 0x23a   :  { %1680 = vst [vmem:[%s4432_s2 + $0x20] sm:$0xff] %v1616_v21  ;;  %v1634_v26 = vmax.f32 %v1570_v10, 0.0  ;;  %v1635_v33 = vmax.f32 %v1571_v7, 0.0  ;;  %v1358_v51 = vmul.f32 %v1851_v11, %v3904_v30 }
 0x23b   :  { %1681 = vst.msk [vmem:[%s4432_s2 + $0x28] sm:$0xff] %vm75_vm0, %v1617_v22  ;;  %v1451_v14 = vpop.permute.xlu2 %1450 }
 0x23c   :  { %v1572_v38 = vadd.f32 %v1451_v14, %v1348_v36  ;;  %v1573_v42 = vadd.f32 %v1451_v14, %v1349_v8  ;;  %1698 = vst [vmem:[%s4432_s2 + $0xb0] sm:$0xff] %v1634_v26  ;;  %v1852_v36 = vld [vmem:[%s4430_s0 + $0x118] sm:$0xff] }
 0x23d   :  { %v1411_v35 = vpop.permute.xlu1 %1410  ;;  %1699 = vst.msk [vmem:[%s4432_s2 + $0xb8] sm:$0xff] %vm75_vm0, %v1635_v33  ;;  %v1359_v39 = vmul.f32 %v1852_v36, %v3904_v30 }
 0x23e   :  { %v1636_v9 = vmax.f32 %v1572_v38, 0.0  ;;  %v1637_v0 = vmax.f32 %v1573_v42, 0.0  ;;  %v1556_v46 = vadd.f32 %v1411_v35, %v1332_v62  ;;  %v1557_v53 = vadd.f32 %v1411_v35, %v1333_v20  ;;  %v1853_v62 = vld [vmem:[%s4430_s0 + $0x120] sm:$0xff] }
 0x23f   :  { %v1461_v19 = vpop.permute.xlu0 %1460  ;;  %v1360_v30 = vmul.f32 %v1853_v62, %v3897_v25  ;;  %v1361_v20 = vmul.f32 %v1854_v18, %v3897_v25  ;;  %v1856_v25 = vld [vmem:[%s4430_s0 + $0xa8] sm:$0xff]  ;;  %v1865_v18 = vld [vmem:[%s4430_s0 + $0x180] sm:$0xff] }
 0x240   :  { %1700 = vst [vmem:[%s4432_s2 + $0xc0] sm:$0xff] %v1636_v9  ;;  %v1620_v17 = vmax.f32 %v1556_v46, 0.0  ;;  %v1621_v24 = vmax.f32 %v1557_v53, 0.0  ;;  %v1576_v16 = vadd.f32 %v1461_v19, %v1352_v15  ;;  %v1577_v61 = vadd.f32 %v1461_v19, %v1353_v45  ;;  %v1855_v9 = vld [vmem:[%s4430_s0 + $0xa0] sm:$0xff] }
 0x241   :  { %1701 = vst.msk [vmem:[%s4432_s2 + $0xc8] sm:$0xff] %vm75_vm0, %v1637_v0  ;;  %v1344_v0 = vmul.f32 %v1855_v9, %v3900_v3  ;;  %v1345_v46 = vmul.f32 %v1856_v25, %v3900_v3  ;;  %v1857_v3 = vld [vmem:[%s4430_s0 + $0x140] sm:$0xff] }
 0x242   :  { %1684 = vst [vmem:[%s4432_s2 + $0x40] sm:$0xff] %v1620_v17  ;;  %v1640_v2 = vmax.f32 %v1576_v16, 0.0  ;;  %v1641_v6 = vmax.f32 %v1577_v61, 0.0  ;;  %v1364_v19 = vmul.f32 %v1857_v3, %v3914_v48  ;;  %v1858_v16 = vld [vmem:[%s4430_s0 + $0x148] sm:$0xff] }
 0x243   :  { %1685 = vst.msk [vmem:[%s4432_s2 + $0x48] sm:$0xff] %vm75_vm0, %v1621_v24  ;;  %v1466_v44 = vpop.permute.xlu2 %1465  ;;  %v1365_v61 = vmul.f32 %v1858_v16, %v3914_v48 }
 0x244   :  { %v1578_v27 = vadd.f32 %v1466_v44, %v1354_v32  ;;  %v1579_v56 = vadd.f32 %v1466_v44, %v1355_v40  ;;  %1704 = vst [vmem:[%s4432_s2 + $0xe0] sm:$0xff] %v1640_v2  ;;  %v1859_v2 = vld [vmem:[%s4430_s0 + $0x150] sm:$0xff] }
 0x245   :  { %v1426_v21 = vpop.permute.xlu1 %1425  ;;  %1705 = vst.msk [vmem:[%s4432_s2 + $0xe8] sm:$0xff] %vm75_vm0, %v1641_v6  ;;  %v1366_v48 = vmul.f32 %v1859_v2, %v3908_v43  ;;  %v1860_v6 = vld [vmem:[%s4430_s0 + $0x158] sm:$0xff] }
 0x246   :  { %v1642_v22 = vmax.f32 %v1578_v27, 0.0  ;;  %v1643_v5 = vmax.f32 %v1579_v56, 0.0  ;;  %v1562_v10 = vadd.f32 %v1426_v21, %v1338_v49  ;;  %v1563_v7 = vadd.f32 %v1426_v21, %v1339_v34  ;;  %v1861_v27 = vld [vmem:[%s4430_s0 + $0xd0] sm:$0xff]  ;;  %v1872_v2 = vld [vmem:[%s4430_s0 + $0x1b8] sm:$0xff] }
 0x247   :  { %v1476_v26 = vpop.permute.xlu0 %1475  ;;  %v1367_v23 = vmul.f32 %v1860_v6, %v3908_v43  ;;  %v1350_v56 = vmul.f32 %v1861_v27, %v3910_v12  ;;  %v1862_v43 = vld [vmem:[%s4430_s0 + $0xd8] sm:$0xff] }
 0x248   :  { %1706 = vst [vmem:[%s4432_s2 + $0xf0] sm:$0xff] %v1642_v22  ;;  %v1626_v8 = vmax.f32 %v1562_v10, 0.0  ;;  %v1627_v14 = vmax.f32 %v1563_v7, 0.0  ;;  %v1582_v33 = vadd.f32 %v1476_v26, %v1358_v51  ;;  %v1583_v1 = vadd.f32 %v1476_v26, %v1359_v39 }
 0x249   :  { %1707 = vst.msk [vmem:[%s4432_s2 + $0xf8] sm:$0xff] %vm75_vm0, %v1643_v5  ;;  %v1351_v21 = vmul.f32 %v1862_v43, %v3910_v12  ;;  %v1863_v12 = vld [vmem:[%s4430_s0 + $0x170] sm:$0xff] }
 0x24a   :  { %1690 = vst [vmem:[%s4432_s2 + $0x70] sm:$0xff] %v1626_v8  ;;  %v1646_v42 = vmax.f32 %v1582_v33, 0.0  ;;  %v1647_v35 = vmax.f32 %v1583_v1, 0.0  ;;  %v1370_v39 = vmul.f32 %v1863_v12, %v3924_v55  ;;  %v1864_v8 = vld [vmem:[%s4430_s0 + $0x178] sm:$0xff] }
 0x24b   :  { %1691 = vst.msk [vmem:[%s4432_s2 + $0x78] sm:$0xff] %vm75_vm0, %v1627_v14  ;;  %v1481_v38 = vpop.permute.xlu2 %1480  ;;  %v1371_v14 = vmul.f32 %v1864_v8, %v3924_v55  ;;  %v1372_v55 = vmul.f32 %v1865_v18, %v3918_v37 }
 0x24c   :  { %v1584_v53 = vadd.f32 %v1481_v38, %v1360_v30  ;;  %v1585_v50 = vadd.f32 %v1481_v38, %v1361_v20  ;;  %1710 = vst [vmem:[%s4432_s2 + $0x110] sm:$0xff] %v1646_v42  ;;  %v1866_v20 = vld [vmem:[%s4430_s0 + $0x188] sm:$0xff] }
 0x24d   :  { %v1441_v15 = vpop.permute.xlu1 %1440  ;;  %1711 = vst.msk [vmem:[%s4432_s2 + $0x118] sm:$0xff] %vm75_vm0, %v1647_v35  ;;  %v1373_v38 = vmul.f32 %v1866_v20, %v3918_v37  ;;  %v1868_v37 = vld [vmem:[%s4430_s0 + $0x108] sm:$0xff]  ;;  %v1879_v20 = vld [vmem:[%s4430_s0 + $0x160] sm:$0xff] }
 0x24e   :  { %v1648_v4 = vmax.f32 %v1584_v53, 0.0  ;;  %v1649_v45 = vmax.f32 %v1585_v50, 0.0  ;;  %v1568_v17 = vadd.f32 %v1441_v15, %v1344_v0  ;;  %v1569_v24 = vadd.f32 %v1441_v15, %v1345_v46  ;;  %v1867_v0 = vld [vmem:[%s4430_s0 + $0x100] sm:$0xff] }
 0x24f   :  { %v1491_v13 = vpop.permute.xlu0 %1490  ;;  %v1356_v25 = vmul.f32 %v1867_v0, %v3920_v52  ;;  %v1357_v46 = vmul.f32 %v1868_v37, %v3920_v52  ;;  %v1869_v52 = vld [vmem:[%s4430_s0 + $0x1a0] sm:$0xff] }
 0x250   :  { %1712 = vst [vmem:[%s4432_s2 + $0x120] sm:$0xff] %v1648_v4  ;;  %v1632_v59 = vmax.f32 %v1568_v17, 0.0  ;;  %v1633_v32 = vmax.f32 %v1569_v24, 0.0  ;;  %v1588_v40 = vadd.f32 %v1491_v13, %v1364_v19  ;;  %v1589_v44 = vadd.f32 %v1491_v13, %v1365_v61  ;;  %v1870_v19 = vld [vmem:[%s4430_s0 + $0x1a8] sm:$0xff] }
 0x251   :  { %1713 = vst.msk [vmem:[%s4432_s2 + $0x128] sm:$0xff] %vm75_vm0, %v1649_v45  ;;  %v1376_v3 = vmul.f32 %v1869_v52, %v3934_v41  ;;  %v1377_v16 = vmul.f32 %v1870_v19, %v3934_v41 }
 0x252   :  { %1696 = vst [vmem:[%s4432_s2 + $0xa0] sm:$0xff] %v1632_v59  ;;  %v1652_v29 = vmax.f32 %v1588_v40, 0.0  ;;  %v1653_v34 = vmax.f32 %v1589_v44, 0.0  ;;  %v1871_v44 = vld [vmem:[%s4430_s0 + $0x1b0] sm:$0xff] }
 0x253   :  { %1697 = vst.msk [vmem:[%s4432_s2 + $0xa8] sm:$0xff] %vm75_vm0, %v1633_v32  ;;  %v1496_v49 = vpop.permute.xlu2 %1495  ;;  %v1378_v41 = vmul.f32 %v1871_v44, %v3928_v63 }
 0x254   :  { %v1590_v22 = vadd.f32 %v1496_v49, %v1366_v48  ;;  %v1591_v5 = vadd.f32 %v1496_v49, %v1367_v23  ;;  %1716 = vst [vmem:[%s4432_s2 + $0x140] sm:$0xff] %v1652_v29  ;;  %v1379_v48 = vmul.f32 %v1872_v2, %v3928_v63  ;;  %v1873_v29 = vld [vmem:[%s4430_s0 + $0x130] sm:$0xff]  ;;  %v1874_v63 = vld [vmem:[%s4430_s0 + $0x138] sm:$0xff] }
 0x255   :  { %v1456_v10 = vpop.permute.xlu1 %1455  ;;  %1717 = vst.msk [vmem:[%s4432_s2 + $0x148] sm:$0xff] %vm75_vm0, %v1653_v34  ;;  %v1362_v34 = vmul.f32 %v1873_v29, %v3930_v60  ;;  %v1363_v27 = vmul.f32 %v1874_v63, %v3930_v60  ;;  %v1875_v60 = vld [vmem:[%s4430_s0 + $0x1d0] sm:$0xff] }
 0x256   :  { %v1654_v7 = vmax.f32 %v1590_v22, 0.0  ;;  %v1655_v11 = vmax.f32 %v1591_v5, 0.0  ;;  %v1574_v51 = vadd.f32 %v1456_v10, %v1350_v56  ;;  %v1575_v36 = vadd.f32 %v1456_v10, %v1351_v21 }
 0x257   :  { %v1506_v1 = vpop.permute.xlu0 %1505 }
 0x258   :  { %1718 = vst [vmem:[%s4432_s2 + $0x150] sm:$0xff] %v1654_v7  ;;  %v1638_v26 = vmax.f32 %v1574_v51, 0.0  ;;  %v1639_v33 = vmax.f32 %v1575_v36, 0.0  ;;  %v1594_v62 = vadd.f32 %v1506_v1, %v1370_v39  ;;  %v1595_v30 = vadd.f32 %v1506_v1, %v1371_v14  ;;  %v1876_v51 = vld [vmem:[%s4430_s0 + $0x1d8] sm:$0xff]  ;;  %v1878_v1 = vld [vmem:[%s4430_s0 + $0x1e8] sm:$0xff] }
 0x259   :  { %1719 = vst.msk [vmem:[%s4432_s2 + $0x158] sm:$0xff] %vm75_vm0, %v1655_v11  ;;  %v1382_v11 = vmul.f32 %v1875_v60, %v3942_v28  ;;  %v1383_v36 = vmul.f32 %v1876_v51, %v3942_v28 }
 0x25a   :  { %1702 = vst [vmem:[%s4432_s2 + $0xd0] sm:$0xff] %v1638_v26  ;;  %v1658_v35 = vmax.f32 %v1594_v62, 0.0  ;;  %v1659_v9 = vmax.f32 %v1595_v30, 0.0  ;;  %v1385_v62 = vmul.f32 %v1878_v1, %v3938_v47 }
 0x25b   :  { %1703 = vst.msk [vmem:[%s4432_s2 + $0xd8] sm:$0xff] %vm75_vm0, %v1639_v33  ;;  %v1511_v42 = vpop.permute.xlu2 %1510  ;;  %v1877_v33 = vld [vmem:[%s4430_s0 + $0x1e0] sm:$0xff] }
 0x25c   :  { %v1596_v53 = vadd.f32 %v1511_v42, %v1372_v55  ;;  %v1597_v50 = vadd.f32 %v1511_v42, %v1373_v38  ;;  %1722 = vst [vmem:[%s4432_s2 + $0x170] sm:$0xff] %v1658_v35  ;;  %v1384_v28 = vmul.f32 %v1877_v33, %v3938_v47  ;;  %v1368_v38 = vmul.f32 %v1879_v20, %v3940_v57  ;;  %v1880_v47 = vld [vmem:[%s4430_s0 + $0x168] sm:$0xff] }
 0x25d   :  { %v1471_v15 = vpop.permute.xlu1 %1470  ;;  %1723 = vst.msk [vmem:[%s4432_s2 + $0x178] sm:$0xff] %vm75_vm0, %v1659_v9  ;;  %v1369_v42 = vmul.f32 %v1880_v47, %v3940_v57 }
 0x25e   :  { %v1660_v4 = vmax.f32 %v1596_v53, 0.0  ;;  %v1661_v45 = vmax.f32 %v1597_v50, 0.0  ;;  %v1580_v17 = vadd.f32 %v1471_v15, %v1356_v25  ;;  %v1581_v24 = vadd.f32 %v1471_v15, %v1357_v46  ;;  %v1881_v15 = vld [vmem:[%s4430_s0 + $0x190] sm:$0xff] }
 0x25f   :  { %v1521_v32 = vpop.permute.xlu0 %1520 }
 0x260   :  { %1724 = vst [vmem:[%s4432_s2 + $0x180] sm:$0xff] %v1660_v4  ;;  %v1644_v61 = vmax.f32 %v1580_v17, 0.0  ;;  %v1645_v59 = vmax.f32 %v1581_v24, 0.0  ;;  %v1600_v13 = vadd.f32 %v1521_v32, %v1376_v3  ;;  %v1601_v40 = vadd.f32 %v1521_v32, %v1377_v16 }
 0x261   :  { %1725 = vst.msk [vmem:[%s4432_s2 + $0x188] sm:$0xff] %vm75_vm0, %v1661_v45  ;;  %v1374_v4 = vmul.f32 %v1881_v15, %v3952_v58  ;;  %v1882_v45 = vld [vmem:[%s4430_s0 + $0x198] sm:$0xff] }
 0x262   :  { %1708 = vst [vmem:[%s4432_s2 + $0x100] sm:$0xff] %v1644_v61  ;;  %v1664_v23 = vmax.f32 %v1600_v13, 0.0  ;;  %v1665_v49 = vmax.f32 %v1601_v40, 0.0  ;;  %v1375_v17 = vmul.f32 %v1882_v45, %v3952_v58  ;;  %v1883_v61 = vld [vmem:[%s4430_s0 + $0x1c0] sm:$0xff] }
 0x263   :  { %1709 = vst.msk [vmem:[%s4432_s2 + $0x108] sm:$0xff] %vm75_vm0, %v1645_v59  ;;  %v1526_v6 = vpop.permute.xlu2 %1525  ;;  %v1380_v58 = vmul.f32 %v1883_v61, %v3977_v54  ;;  %v1884_v59 = vld [vmem:[%s4430_s0 + $0x1c8] sm:$0xff] }
 0x264   :  { %v1602_v56 = vadd.f32 %v1526_v6, %v1378_v41  ;;  %v1603_v43 = vadd.f32 %v1526_v6, %v1379_v48  ;;  %1728 = vst [vmem:[%s4432_s2 + $0x1a0] sm:$0xff] %v1664_v23  ;;  %v1381_v32 = vmul.f32 %v1884_v59, %v3977_v54  ;;  %v1885_v48 = vld [vmem:[%s4430_s0 + $0x1f0] sm:$0xff]  ;;  %v1886_v6 = vld [vmem:[%s4430_s0 + $0x1f8] sm:$0xff] }
 0x265   :  { %v1486_v21 = vpop.permute.xlu1 %1485  ;;  %1729 = vst.msk [vmem:[%s4432_s2 + $0x1a8] sm:$0xff] %vm75_vm0, %v1665_v49  ;;  %v1386_v54 = vmul.f32 %v1885_v48, %v4009_v31  ;;  %v1387_v23 = vmul.f32 %v1886_v6, %v4009_v31 }
 0x266   :  { %v1666_v22 = vmax.f32 %v1602_v56, 0.0  ;;  %v1667_v5 = vmax.f32 %v1603_v43, 0.0  ;;  %v1586_v10 = vadd.f32 %v1486_v21, %v1362_v34  ;;  %v1587_v7 = vadd.f32 %v1486_v21, %v1363_v27 }
 0x267   :  { %v1536_v8 = vpop.permute.xlu0 %1535 }
 0x268   :  { %1730 = vst [vmem:[%s4432_s2 + $0x1b0] sm:$0xff] %v1666_v22  ;;  %v1650_v12 = vmax.f32 %v1586_v10, 0.0  ;;  %v1651_v39 = vmax.f32 %v1587_v7, 0.0  ;;  %v1606_v14 = vadd.f32 %v1536_v8, %v1382_v11  ;;  %v1607_v26 = vadd.f32 %v1536_v8, %v1383_v36 }
 0x269   :  { %1731 = vst.msk [vmem:[%s4432_s2 + $0x1b8] sm:$0xff] %vm75_vm0, %v1667_v5 }
 0x26a   :  { %1714 = vst [vmem:[%s4432_s2 + $0x130] sm:$0xff] %v1650_v12  ;;  %v1670_v18 = vmax.f32 %v1606_v14, 0.0  ;;  %v1671_v55 = vmax.f32 %v1607_v26, 0.0 }
 0x26b   :  { %1715 = vst.msk [vmem:[%s4432_s2 + $0x138] sm:$0xff] %vm75_vm0, %v1651_v39  ;;  %v1541_v30 = vpop.permute.xlu2 %1540 }
 0x26c   :  { %v1608_v35 = vadd.f32 %v1541_v30, %v1384_v28  ;;  %v1609_v9 = vadd.f32 %v1541_v30, %v1385_v62  ;;  %1734 = vst [vmem:[%s4432_s2 + $0x1d0] sm:$0xff] %v1670_v18 }
 0x26d   :  { %v1501_v0 = vpop.permute.xlu1 %1500  ;;  %1735 = vst.msk [vmem:[%s4432_s2 + $0x1d8] sm:$0xff] %vm75_vm0, %v1671_v55 }
 0x26e   :  { %v1672_v25 = vmax.f32 %v1608_v35, 0.0  ;;  %v1673_v37 = vmax.f32 %v1609_v9, 0.0  ;;  %v1592_v46 = vadd.f32 %v1501_v0, %v1368_v38  ;;  %v1593_v53 = vadd.f32 %v1501_v0, %v1369_v42 }
 0x270   :  { %1736 = vst [vmem:[%s4432_s2 + $0x1e0] sm:$0xff] %v1672_v25  ;;  %v1656_v57 = vmax.f32 %v1592_v46, 0.0  ;;  %v1657_v50 = vmax.f32 %v1593_v53, 0.0 }
 0x271   :  { %1737 = vst.msk [vmem:[%s4432_s2 + $0x1e8] sm:$0xff] %vm75_vm0, %v1673_v37 }
 0x272   :  { %1720 = vst [vmem:[%s4432_s2 + $0x160] sm:$0xff] %v1656_v57 }
 0x273   :  { %1721 = vst.msk [vmem:[%s4432_s2 + $0x168] sm:$0xff] %vm75_vm0, %v1657_v50 }
 0x275   :  { %v1516_v24 = vpop.permute.xlu1 %1515 }
 0x276   :  { %v1598_v52 = vadd.f32 %v1516_v24, %v1374_v4  ;;  %v1599_v3 = vadd.f32 %v1516_v24, %v1375_v17 }
 0x278   :  { %v1662_v19 = vmax.f32 %v1598_v52, 0.0  ;;  %v1663_v16 = vmax.f32 %v1599_v3, 0.0 }
 0x27a   :  { %1726 = vst [vmem:[%s4432_s2 + $0x190] sm:$0xff] %v1662_v19 }
 0x27b   :  { %1727 = vst.msk [vmem:[%s4432_s2 + $0x198] sm:$0xff] %vm75_vm0, %v1663_v16 }
 0x27d   :  { %v1531_v13 = vpop.permute.xlu1 %1530 }
 0x27e   :  { %v1604_v40 = vadd.f32 %v1531_v13, %v1380_v58  ;;  %v1605_v44 = vadd.f32 %v1531_v13, %v1381_v32 }
 0x280   :  { %v1668_v41 = vmax.f32 %v1604_v40, 0.0  ;;  %v1669_v2 = vmax.f32 %v1605_v44, 0.0 }
 0x282   :  { %1732 = vst [vmem:[%s4432_s2 + $0x1c0] sm:$0xff] %v1668_v41 }
 0x283   :  { %1733 = vst.msk [vmem:[%s4432_s2 + $0x1c8] sm:$0xff] %vm75_vm0, %v1669_v2 }
 0x285   :  { %v1546_v49 = vpop.permute.xlu1 %1545 }
 0x286   :  { %v1610_v29 = vadd.f32 %v1546_v49, %v1386_v54  ;;  %v1611_v34 = vadd.f32 %v1546_v49, %v1387_v23 }
 0x288   :  { %v1674_v63 = vmax.f32 %v1610_v29, 0.0  ;;  %v1675_v27 = vmax.f32 %v1611_v34, 0.0 }
 0x28a   :  { %1738 = vst [vmem:[%s4432_s2 + $0x1f0] sm:$0xff] %v1674_v63 }
 0x28b   :  { %1739 = vst.msk [vmem:[%s4432_s2 + $0x1f8] sm:$0xff] %vm75_vm0, %v1675_v27 }

</bundles_post_ra>
